<compile_context>
chip_gen: v7x
topology: tpu7x:2x2x1
jax: 0.10.0
libtpu: 0.0.40
codegen_flags: <defaults>
</compile_context>

<pallas_src>
import functools

import jax
import jax.numpy as jnp
import numpy as np
from jax import lax
from jax.experimental import pallas as pl
from jax.experimental.pallas import tpu as pltpu

BN_EPS = 1e-5


# ---------------------------------------------------------------------------
# Kernel 1: conv row-stripe = im2col patch assembly in VMEM + ONE MXU matmul,
#           plus BatchNorm partial statistics accumulated per image.
# ---------------------------------------------------------------------------
def _conv_stats_kernel(x_ref, w_ref, o_ref, psum_ref, pssq_ref, patch_ref, *,
                       k, th, Wo, Cin, Cpad):
    # x_ref    : (Hp, Wp, Cin)      bf16  -- whole padded image (batch squeezed)
    # w_ref    : (k*k*Cin, Cpad)    bf16  -- weights, Cout padded lane-dense
    # o_ref    : (th*Wo, Cpad)      bf16  -- conv rows of this output-row stripe
    # psum_ref : (1, Cpad)          f32   -- per-image sum, accumulated over stripes
    # pssq_ref : (1, Cpad)          f32   -- per-image sum of squares
    # patch_ref: (th, Wo, k*k*Cin)  bf16  -- VMEM im2col patch scratch
    ti = pl.program_id(1)
    r0 = pl.multiple_of(ti * th, th)          # first output row of this stripe (stride=1)

    # Assemble the im2col patch with k*k small lane-slice copies (tiny traffic),
    # so the whole conv for this stripe is ONE contraction of depth k*k*Cin.
    for kh in range(k):
        for kw in range(k):
            tap = kh * k + kw
            xs = x_ref[pl.ds(r0 + kh, th), pl.ds(kw, Wo), :]       # (th, Wo, Cin)
            patch_ref[:, :, tap * Cin:(tap + 1) * Cin] = xs

    # (th, Wo, Kc) -> (th*Wo, Kc): leading-dim collapse only (layout-free, Wo % 8 == 0).
    patch = patch_ref[...].reshape(th * Wo, k * k * Cin)
    acc = jnp.dot(patch, w_ref[...], preferred_element_type=jnp.float32)   # (th*Wo, Cpad) f32
    o_ref[...] = acc.astype(o_ref.dtype)

    # BN batch-stat partials straight from the f32 accumulator (no extra HBM read);
    # the (1, Cpad) stats block is revisited across stripes of one image -> accumulate.
    @pl.when(ti == 0)
    def _():
        psum_ref[...] = jnp.zeros_like(psum_ref)
        pssq_ref[...] = jnp.zeros_like(pssq_ref)

    psum_ref[...] += jnp.sum(acc, axis=0, keepdims=True)
    pssq_ref[...] += jnp.sum(acc * acc, axis=0, keepdims=True)


# ---------------------------------------------------------------------------
# Kernel 2: BatchNorm apply (precomputed scale/shift) + ReLU, writing the final
#           NCHW (Cout-only, lane-dense over Ho*Wo) output directly.
# ---------------------------------------------------------------------------
def _bn_relu_nchw_kernel(x_ref, scale_ref, shift_ref, o_ref, *, cout):
    # x_ref: (tm, Cpad) bf16; scale/shift: (1, Cpad) f32; o_ref: (cout, tm) f32
    x = x_ref[...].astype(jnp.float32)
    y = jnp.maximum(x * scale_ref[...] + shift_ref[...], 0.0)     # (tm, Cpad)
    yt = jnp.transpose(y)                                         # XLU transpose -> (Cpad, tm)
    o_ref[...] = yt[:cout, :]                                     # only real channels hit HBM


# ---------------------------------------------------------------------------
# Tile pickers (VMEM-budget driven, v7x-safe)
# ---------------------------------------------------------------------------
def _pick_row_stripe(Ho, Wo, Hp, Wp, Cin, Cpad, k,
                     budget_bytes=20 << 20, max_rows=4096):
    """Output-row stripe height th: divisor of Ho, th*Wo % 8 == 0, VMEM-bounded."""
    cands = []
    for th in range(1, Ho + 1):
        if Ho % th:
            continue
        m = th * Wo
        if m % 8:
            continue
        need = (2 * Hp * Wp * Cin * 2          # double-buffered padded image (bf16)
                + 2 * k * k * Cin * Cpad * 2   # weights (bf16)
                + 2 * m * Cpad * 2             # double-buffered conv-out stripe (bf16)
                + 4 * Cpad * 4                 # stats blocks
                + m * k * k * Cin * 2          # im2col patch scratch (bf16)
                + m * Cpad * 4)                # f32 accumulator value
        if need > budget_bytes or m > max_rows:
            continue
        cands.append(th)
    if not cands:
        return None
    # Prefer >= 2 stripes per image (pipeline / megacore) while keeping >=128-row tiles.
    pref = [t for t in cands if t <= Ho // 2 and t * Wo >= 128]
    return max(pref) if pref else max(cands)


def _pick_hw_tile(HW, cap=2048):
    """Largest multiple-of-128 divisor of HW (lane-dense output); prefer >=2 tiles."""
    cands = [t for t in range(128, min(HW, cap) + 1, 128) if HW % t == 0]
    if not cands:
        return HW                      # whole image per step (block == full dims is legal)
    pref = [t for t in cands if t <= HW // 2]
    return max(pref) if pref else max(cands)


# ---------------------------------------------------------------------------
# Wrapper
# ---------------------------------------------------------------------------
@functools.partial(jax.jit, static_argnames=("k", "stride"))
def convolution_forward(x_nchw, w_oihw, gamma, beta, *, k, stride=1):
    """Forward pass of `convolution` (with_bn=True, training-mode batch stats)."""
    # TODO(synk): stride > 1 path (strided patch extraction) not implemented.
    assert stride == 1, "only stride=1 is implemented"
    N, Cin, H, W = x_nchw.shape
    Cout = w_oihw.shape[0]
    pad = (k - 1) // 2
    Ho = (H + 2 * pad - k) // stride + 1
    Wo = (W + 2 * pad - k) // stride + 1
    Hp, Wp = H + 2 * pad, W + 2 * pad
    HW = Ho * Wo
    Mtot = N * HW
    Cpad = ((Cout + 127) // 128) * 128      # lane-dense output channels for the matmul
    Kc = k * k * Cin                        # folded contraction depth

    th = _pick_row_stripe(Ho, Wo, Hp, Wp, Cin, Cpad, k)
    # TODO(synk): generalize to Ho*Wo not a multiple of 8 (needs M padding + stat masking).
    assert th is not None, "no valid row-stripe tiling for this shape"
    n_stripes = Ho // th

    # --- glue: NCHW -> NHWC bf16 -> spatial zero pad --------------------------
    # TODO(synk): fold the zero padding into the kernel with guarded halo loads to
    # avoid materializing the padded input in HBM when Cin*H*W is large.
    x_nhwc = jnp.transpose(x_nchw, (0, 2, 3, 1)).astype(jnp.bfloat16)
    x_pad = jnp.pad(x_nhwc, ((0, 0), (pad, pad), (pad, pad), (0, 0)))   # (N, Hp, Wp, Cin)

    # Weights: (Cout, Cin, kh, kw) -> (kh, kw, Cin, Cout) -> (k*k*Cin, Cpad) bf16,
    # matching the patch column order (kh, kw, c).
    w2 = jnp.transpose(w_oihw, (2, 3, 1, 0)).reshape(Kc, Cout)
    w2 = jnp.pad(w2, ((0, 0), (0, Cpad - Cout))).astype(jnp.bfloat16)

    conv_kernel = functools.partial(
        _conv_stats_kernel, k=k, th=th, Wo=Wo, Cin=Cin, Cpad=Cpad)

    # --- Pallas kernel 1: striped conv + BN partial statistics ----------------
    conv_out, psum, pssq = pl.pallas_call(
        conv_kernel,
        out_shape=(
            jax.ShapeDtypeStruct((Mtot, Cpad), jnp.bfloat16),   # conv activations
            jax.ShapeDtypeStruct((N, 1, Cpad), jnp.float32),    # per-image sum
            jax.ShapeDtypeStruct((N, 1, Cpad), jnp.float32),    # per-image sum of squares
        ),
        grid_spec=pltpu.PrefetchScalarGridSpec(
            num_scalar_prefetch=0,
            grid=(N, n_stripes),
            in_specs=[
                # Whole padded image per n (re-DMA'd only when n changes).
                pl.BlockSpec((None, Hp, Wp, Cin), lambda n, ti: (n, 0, 0, 0)),
                pl.BlockSpec((Kc, Cpad), lambda n, ti: (0, 0)),
            ],
            out_specs=(
                pl.BlockSpec((th * Wo, Cpad), lambda n, ti: (n * n_stripes + ti, 0)),
                pl.BlockSpec((None, 1, Cpad), lambda n, ti: (n, 0, 0)),
                pl.BlockSpec((None, 1, Cpad), lambda n, ti: (n, 0, 0)),
            ),
            scratch_shapes=[pltpu.VMEM((th, Wo, Kc), jnp.bfloat16)],
        ),
        compiler_params=pltpu.CompilerParams(
            # Stats accumulate across stripes -> stripe axis must stay "arbitrary";
            # batch axis is "parallel" for megacore.
            dimension_semantics=("parallel", "arbitrary"),
            vmem_limit_bytes=32 * 1024 * 1024),
        cost_estimate=pl.CostEstimate(
            flops=2 * Mtot * Kc * Cpad,
            transcendentals=0,
            bytes_accessed=(x_pad.size * 2 + w2.size * 2
                            + Mtot * Cpad * 2 + 2 * N * Cpad * 4)),
    )(x_pad, w2)

    # --- tiny glue: fold partial stats into per-channel scale / shift ---------
    m_f = jnp.float32(Mtot)
    mean = jnp.sum(psum, axis=(0, 1)) / m_f                               # (Cpad,)
    var = jnp.maximum(jnp.sum(pssq, axis=(0, 1)) / m_f - mean * mean, 0.0)  # biased (training)
    inv = lax.rsqrt(var + BN_EPS)
    gamma_p = jnp.pad(gamma.astype(jnp.float32), (0, Cpad - Cout))
    beta_p = jnp.pad(beta.astype(jnp.float32), (0, Cpad - Cout))
    scale = (gamma_p * inv).reshape(1, Cpad)
    shift = (beta_p - mean * gamma_p * inv).reshape(1, Cpad)

    # --- Pallas kernel 2: BN apply + ReLU, writes NCHW (Cout only) directly ---
    tm = _pick_hw_tile(HW)
    n_mtiles = HW // tm
    bn_kernel = functools.partial(_bn_relu_nchw_kernel, cout=Cout)
    out3 = pl.pallas_call(
        bn_kernel,
        out_shape=jax.ShapeDtypeStruct((N, Cout, HW), jnp.float32),
        grid_spec=pltpu.PrefetchScalarGridSpec(
            num_scalar_prefetch=0,
            grid=(N, n_mtiles),
            in_specs=[
                pl.BlockSpec((tm, Cpad), lambda n, j: (n * n_mtiles + j, 0)),
                pl.BlockSpec((1, Cpad), lambda n, j: (0, 0)),
                pl.BlockSpec((1, Cpad), lambda n, j: (0, 0)),
            ],
            out_specs=pl.BlockSpec((None, Cout, tm), lambda n, j: (n, 0, j)),
        ),
        compiler_params=pltpu.CompilerParams(
            dimension_semantics=("parallel", "parallel"),
            vmem_limit_bytes=32 * 1024 * 1024),
    )(conv_out, scale, shift)

    # Free metadata reshape: (N, Cout, Ho*Wo) -> (N, Cout, Ho, Wo).
    return out3.reshape(N, Cout, Ho, Wo)


# ---------------------------------------------------------------------------
# Pure-JAX f32 reference (matches PyTorch training-mode forward)
# ---------------------------------------------------------------------------
def reference_forward(x_nchw, w_oihw, gamma, beta, *, k, stride=1):
    pad = (k - 1) // 2
    conv = lax.conv_general_dilated(
        x_nchw, w_oihw,
        window_strides=(stride, stride),
        padding=((pad, pad), (pad, pad)),
        dimension_numbers=("NCHW", "OIHW", "NCHW"),
    )
    mean = jnp.mean(conv, axis=(0, 2, 3), keepdims=True)
    var = jnp.mean((conv - mean) ** 2, axis=(0, 2, 3), keepdims=True)  # biased
    bn = (conv - mean) * lax.rsqrt(var + BN_EPS)
    bn = bn * gamma.reshape(1, -1, 1, 1) + beta.reshape(1, -1, 1, 1)
    return jnp.maximum(bn, 0.0)


if __name__ == "__main__":
    # Module config: convolution(k=3, inp_dim=4, out_dim=8, stride=1, with_bn=True)
    k, inp_dim, out_dim, stride = 3, 4, 8, 1
    N, H, W = 2, 16, 16

    key = jax.random.PRNGKey(0)
    kx, kw, kg, kb = jax.random.split(key, 4)
    x = jax.random.normal(kx, (N, inp_dim, H, W), dtype=jnp.float32)
    # Conv2d weight (Cout, Cin, k, k); with_bn=True -> no conv bias.
    w = 0.1 * jax.random.normal(kw, (out_dim, inp_dim, k, k), dtype=jnp.float32)
    # Deterministic, nontrivial BatchNorm affine params.
    gamma = 1.0 + 0.05 * jax.random.normal(kg, (out_dim,), dtype=jnp.float32)
    beta = 0.05 * jax.random.normal(kb, (out_dim,), dtype=jnp.float32)

    out = convolution_forward(x, w, gamma, beta, k=k, stride=stride)
    out = jax.block_until_ready(out)

    ref = reference_forward(x, w, gamma, beta, k=k, stride=stride)
    # bf16 MXU operands + bf16 intermediate -> compare at bf16-appropriate tolerance.
    np.testing.assert_allclose(np.asarray(out), np.asarray(ref), rtol=2e-2, atol=2e-2)

    print("KERNEL_OK")
</pallas_src>

<mosaic_0001>
module attributes {stable_mosaic.version = 11 : i64} {
  func.func @_conv_stats_kernel(%arg0: i32, %arg1: i32, %arg2: memref<1x18x18x4xbf16, #tpu.memory_space<vmem>>, %arg3: memref<36x128xbf16, #tpu.memory_space<vmem>>, %arg4: memref<128x128xbf16, #tpu.memory_space<vmem>>, %arg5: memref<1x1x128xf32, #tpu.memory_space<vmem>>, %arg6: memref<1x1x128xf32, #tpu.memory_space<vmem>>, %arg7: memref<8x16x36xbf16, #tpu.memory_space<vmem>>) attributes {dimension_semantics = [#tpu.dimension_semantics<parallel>, #tpu.dimension_semantics<arbitrary>], iteration_bounds = array<i64: 2, 2>, scalar_prefetch = 0 : i64, scratch_operands = 1 : i64, tpu.core_type = #tpu.core_type<tc>, window_params = [{transform_indices = @transform_0, window_bounds = array<i64: 1, 18, 18, 4>}, {pipeline_mode = #tpu.pipeline_mode<synchronous>, transform_indices = @transform_1, window_bounds = array<i64: 36, 128>}, {transform_indices = @transform_2, window_bounds = array<i64: 128, 128>}, {transform_indices = @transform_3, window_bounds = array<i64: 1, 1, 128>}, {transform_indices = @transform_4, window_bounds = array<i64: 1, 1, 128>}]} {
    %c8_i32 = arith.constant 8 : i32
    %0 = arith.muli %arg1, %c8_i32 : i32
    %1 = tpu.assume_multiple %0, 8 : i32
    %c0_i32 = arith.constant 0 : i32
    %2 = arith.addi %1, %c0_i32 : i32
    %c0 = arith.constant 0 : index
    %3 = arith.index_cast %2 : i32 to index
    %c0_0 = arith.constant 0 : index
    %c0_1 = arith.constant 0 : index
    %4 = vector.load %arg2[%c0, %3, %c0_0, %c0_1] : memref<1x18x18x4xbf16, #tpu.memory_space<vmem>>, vector<1x8x16x4xbf16>
    %5 = vector.shape_cast %4 : vector<1x8x16x4xbf16> to vector<8x16x4xbf16>
    %c0_2 = arith.constant 0 : index
    %c0_3 = arith.constant 0 : index
    %c0_4 = arith.constant 0 : index
    %6 = vector.load %arg7[%c0_2, %c0_3, %c0_4] : memref<8x16x36xbf16, #tpu.memory_space<vmem>>, vector<8x16x4xbf16>
    tpu.vector_store %arg7[%c0_2, %c0_3, %c0_4], %5 {strides = array<i32>} : memref<8x16x36xbf16, #tpu.memory_space<vmem>>, vector<8x16x4xbf16>,
    %c0_i32_5 = arith.constant 0 : i32
    %7 = arith.addi %1, %c0_i32_5 : i32
    %c0_6 = arith.constant 0 : index
    %8 = arith.index_cast %7 : i32 to index
    %c1 = arith.constant 1 : index
    %c0_7 = arith.constant 0 : index
    %9 = vector.load %arg2[%c0_6, %8, %c1, %c0_7] : memref<1x18x18x4xbf16, #tpu.memory_space<vmem>>, vector<1x8x16x4xbf16>
    %10 = vector.shape_cast %9 : vector<1x8x16x4xbf16> to vector<8x16x4xbf16>
    %c0_8 = arith.constant 0 : index
    %c0_9 = arith.constant 0 : index
    %c4 = arith.constant 4 : index
    %11 = vector.load %arg7[%c0_8, %c0_9, %c4] : memref<8x16x36xbf16, #tpu.memory_space<vmem>>, vector<8x16x4xbf16>
    tpu.vector_store %arg7[%c0_8, %c0_9, %c4], %10 {strides = array<i32>} : memref<8x16x36xbf16, #tpu.memory_space<vmem>>, vector<8x16x4xbf16>,
    %c0_i32_10 = arith.constant 0 : i32
    %12 = arith.addi %1, %c0_i32_10 : i32
    %c0_11 = arith.constant 0 : index
    %13 = arith.index_cast %12 : i32 to index
    %c2 = arith.constant 2 : index
    %c0_12 = arith.constant 0 : index
    %14 = vector.load %arg2[%c0_11, %13, %c2, %c0_12] : memref<1x18x18x4xbf16, #tpu.memory_space<vmem>>, vector<1x8x16x4xbf16>
    %15 = vector.shape_cast %14 : vector<1x8x16x4xbf16> to vector<8x16x4xbf16>
    %c0_13 = arith.constant 0 : index
    %c0_14 = arith.constant 0 : index
    %c8 = arith.constant 8 : index
    %16 = vector.load %arg7[%c0_13, %c0_14, %c8] : memref<8x16x36xbf16, #tpu.memory_space<vmem>>, vector<8x16x4xbf16>
    tpu.vector_store %arg7[%c0_13, %c0_14, %c8], %15 {strides = array<i32>} : memref<8x16x36xbf16, #tpu.memory_space<vmem>>, vector<8x16x4xbf16>,
    %c1_i32 = arith.constant 1 : i32
    %17 = arith.addi %1, %c1_i32 : i32
    %c0_15 = arith.constant 0 : index
    %18 = arith.index_cast %17 : i32 to index
    %c0_16 = arith.constant 0 : index
    %c0_17 = arith.constant 0 : index
    %19 = vector.load %arg2[%c0_15, %18, %c0_16, %c0_17] : memref<1x18x18x4xbf16, #tpu.memory_space<vmem>>, vector<1x8x16x4xbf16>
    %20 = vector.shape_cast %19 : vector<1x8x16x4xbf16> to vector<8x16x4xbf16>
    %c0_18 = arith.constant 0 : index
    %c0_19 = arith.constant 0 : index
    %c12 = arith.constant 12 : index
    %21 = vector.load %arg7[%c0_18, %c0_19, %c12] : memref<8x16x36xbf16, #tpu.memory_space<vmem>>, vector<8x16x4xbf16>
    tpu.vector_store %arg7[%c0_18, %c0_19, %c12], %20 {strides = array<i32>} : memref<8x16x36xbf16, #tpu.memory_space<vmem>>, vector<8x16x4xbf16>,
    %c1_i32_20 = arith.constant 1 : i32
    %22 = arith.addi %1, %c1_i32_20 : i32
    %c0_21 = arith.constant 0 : index
    %23 = arith.index_cast %22 : i32 to index
    %c1_22 = arith.constant 1 : index
    %c0_23 = arith.constant 0 : index
    %24 = vector.load %arg2[%c0_21, %23, %c1_22, %c0_23] : memref<1x18x18x4xbf16, #tpu.memory_space<vmem>>, vector<1x8x16x4xbf16>
    %25 = vector.shape_cast %24 : vector<1x8x16x4xbf16> to vector<8x16x4xbf16>
    %c0_24 = arith.constant 0 : index
    %c0_25 = arith.constant 0 : index
    %c16 = arith.constant 16 : index
    %26 = vector.load %arg7[%c0_24, %c0_25, %c16] : memref<8x16x36xbf16, #tpu.memory_space<vmem>>, vector<8x16x4xbf16>
    tpu.vector_store %arg7[%c0_24, %c0_25, %c16], %25 {strides = array<i32>} : memref<8x16x36xbf16, #tpu.memory_space<vmem>>, vector<8x16x4xbf16>,
    %c1_i32_26 = arith.constant 1 : i32
    %27 = arith.addi %1, %c1_i32_26 : i32
    %c0_27 = arith.constant 0 : index
    %28 = arith.index_cast %27 : i32 to index
    %c2_28 = arith.constant 2 : index
    %c0_29 = arith.constant 0 : index
    %29 = vector.load %arg2[%c0_27, %28, %c2_28, %c0_29] : memref<1x18x18x4xbf16, #tpu.memory_space<vmem>>, vector<1x8x16x4xbf16>
    %30 = vector.shape_cast %29 : vector<1x8x16x4xbf16> to vector<8x16x4xbf16>
    %c0_30 = arith.constant 0 : index
    %c0_31 = arith.constant 0 : index
    %c20 = arith.constant 20 : index
    %31 = vector.load %arg7[%c0_30, %c0_31, %c20] : memref<8x16x36xbf16, #tpu.memory_space<vmem>>, vector<8x16x4xbf16>
    tpu.vector_store %arg7[%c0_30, %c0_31, %c20], %30 {strides = array<i32>} : memref<8x16x36xbf16, #tpu.memory_space<vmem>>, vector<8x16x4xbf16>,
    %c2_i32 = arith.constant 2 : i32
    %32 = arith.addi %1, %c2_i32 : i32
    %c0_32 = arith.constant 0 : index
    %33 = arith.index_cast %32 : i32 to index
    %c0_33 = arith.constant 0 : index
    %c0_34 = arith.constant 0 : index
    %34 = vector.load %arg2[%c0_32, %33, %c0_33, %c0_34] : memref<1x18x18x4xbf16, #tpu.memory_space<vmem>>, vector<1x8x16x4xbf16>
    %35 = vector.shape_cast %34 : vector<1x8x16x4xbf16> to vector<8x16x4xbf16>
    %c0_35 = arith.constant 0 : index
    %c0_36 = arith.constant 0 : index
    %c24 = arith.constant 24 : index
    %36 = vector.load %arg7[%c0_35, %c0_36, %c24] : memref<8x16x36xbf16, #tpu.memory_space<vmem>>, vector<8x16x4xbf16>
    tpu.vector_store %arg7[%c0_35, %c0_36, %c24], %35 {strides = array<i32>} : memref<8x16x36xbf16, #tpu.memory_space<vmem>>, vector<8x16x4xbf16>,
    %c2_i32_37 = arith.constant 2 : i32
    %37 = arith.addi %1, %c2_i32_37 : i32
    %c0_38 = arith.constant 0 : index
    %38 = arith.index_cast %37 : i32 to index
    %c1_39 = arith.constant 1 : index
    %c0_40 = arith.constant 0 : index
    %39 = vector.load %arg2[%c0_38, %38, %c1_39, %c0_40] : memref<1x18x18x4xbf16, #tpu.memory_space<vmem>>, vector<1x8x16x4xbf16>
    %40 = vector.shape_cast %39 : vector<1x8x16x4xbf16> to vector<8x16x4xbf16>
    %c0_41 = arith.constant 0 : index
    %c0_42 = arith.constant 0 : index
    %c28 = arith.constant 28 : index
    %41 = vector.load %arg7[%c0_41, %c0_42, %c28] : memref<8x16x36xbf16, #tpu.memory_space<vmem>>, vector<8x16x4xbf16>
    tpu.vector_store %arg7[%c0_41, %c0_42, %c28], %40 {strides = array<i32>} : memref<8x16x36xbf16, #tpu.memory_space<vmem>>, vector<8x16x4xbf16>,
    %c2_i32_43 = arith.constant 2 : i32
    %42 = arith.addi %1, %c2_i32_43 : i32
    %c0_44 = arith.constant 0 : index
    %43 = arith.index_cast %42 : i32 to index
    %c2_45 = arith.constant 2 : index
    %c0_46 = arith.constant 0 : index
    %44 = vector.load %arg2[%c0_44, %43, %c2_45, %c0_46] : memref<1x18x18x4xbf16, #tpu.memory_space<vmem>>, vector<1x8x16x4xbf16>
    %45 = vector.shape_cast %44 : vector<1x8x16x4xbf16> to vector<8x16x4xbf16>
    %c0_47 = arith.constant 0 : index
    %c0_48 = arith.constant 0 : index
    %c32 = arith.constant 32 : index
    %46 = vector.load %arg7[%c0_47, %c0_48, %c32] : memref<8x16x36xbf16, #tpu.memory_space<vmem>>, vector<8x16x4xbf16>
    tpu.vector_store %arg7[%c0_47, %c0_48, %c32], %45 {strides = array<i32>} : memref<8x16x36xbf16, #tpu.memory_space<vmem>>, vector<8x16x4xbf16>,
    %c0_49 = arith.constant 0 : index
    %c0_50 = arith.constant 0 : index
    %c0_51 = arith.constant 0 : index
    %47 = vector.load %arg7[%c0_49, %c0_50, %c0_51] : memref<8x16x36xbf16, #tpu.memory_space<vmem>>, vector<8x16x36xbf16>
    %48 = vector.shape_cast %47 : vector<8x16x36xbf16> to vector<128x36xbf16>
    %c0_52 = arith.constant 0 : index
    %c0_53 = arith.constant 0 : index
    %49 = vector.load %arg3[%c0_52, %c0_53] : memref<36x128xbf16, #tpu.memory_space<vmem>>, vector<36x128xbf16>
    %cst = arith.constant dense<0.000000e+00> : vector<128x128xf32>
    %50 = tpu.matmul %48, %49, %cst {dimension_numbers = #tpu.dot_dimension_numbers<[1], [0], [0], [1], [0, 0, 1, 1], [], []>} : vector<128x36xbf16>, vector<36x128xbf16>, vector<128x128xf32> -> vector<128x128xf32>
    %51 = arith.truncf %50 : vector<128x128xf32> to vector<128x128xbf16>
    %c0_54 = arith.constant 0 : index
    %c0_55 = arith.constant 0 : index
    %52 = vector.load %arg4[%c0_54, %c0_55] : memref<128x128xbf16, #tpu.memory_space<vmem>>, vector<128x128xbf16>
    tpu.vector_store %arg4[%c0_54, %c0_55], %51 {strides = array<i32>} : memref<128x128xbf16, #tpu.memory_space<vmem>>, vector<128x128xbf16>,
    %c0_i32_56 = arith.constant 0 : i32
    %53 = arith.cmpi eq, %arg1, %c0_i32_56 : i32
    %54 = arith.extui %53 : i1 to i32
    %c0_i32_57 = arith.constant 0 : i32
    %55 = arith.cmpi ne, %54, %c0_i32_57 : i32
    scf.if %55 {
      %cst_72 = arith.constant 0.000000e+00 : f32
      %73 = vector.broadcast %cst_72 : f32 to vector<1x128xf32>
      %c0_73 = arith.constant 0 : index
      %c0_74 = arith.constant 0 : index
      %c0_75 = arith.constant 0 : index
      %74 = vector.load %arg5[%c0_73, %c0_74, %c0_75] : memref<1x1x128xf32, #tpu.memory_space<vmem>>, vector<1x1x128xf32>
      %75 = vector.shape_cast %74 : vector<1x1x128xf32> to vector<1x128xf32>
      %76 = vector.shape_cast %73 : vector<1x128xf32> to vector<1x1x128xf32>
      tpu.vector_store %arg5[%c0_73, %c0_74, %c0_75], %76 {strides = array<i32>} : memref<1x1x128xf32, #tpu.memory_space<vmem>>, vector<1x1x128xf32>,
      %cst_76 = arith.constant 0.000000e+00 : f32
      %77 = vector.broadcast %cst_76 : f32 to vector<1x128xf32>
      %c0_77 = arith.constant 0 : index
      %c0_78 = arith.constant 0 : index
      %c0_79 = arith.constant 0 : index
      %78 = vector.load %arg6[%c0_77, %c0_78, %c0_79] : memref<1x1x128xf32, #tpu.memory_space<vmem>>, vector<1x1x128xf32>
      %79 = vector.shape_cast %78 : vector<1x1x128xf32> to vector<1x128xf32>
      %80 = vector.shape_cast %77 : vector<1x128xf32> to vector<1x1x128xf32>
      tpu.vector_store %arg6[%c0_77, %c0_78, %c0_79], %80 {strides = array<i32>} : memref<1x1x128xf32, #tpu.memory_space<vmem>>, vector<1x1x128xf32>,
    } else {
    }
    %c0_58 = arith.constant 0 : index
    %c0_59 = arith.constant 0 : index
    %c0_60 = arith.constant 0 : index
    %56 = vector.load %arg5[%c0_58, %c0_59, %c0_60] : memref<1x1x128xf32, #tpu.memory_space<vmem>>, vector<1x1x128xf32>
    %57 = vector.shape_cast %56 : vector<1x1x128xf32> to vector<1x128xf32>
    %cst_61 = arith.constant dense<0.000000e+00> : vector<128xf32>
    %58 = vector.multi_reduction <add>, %50, %cst_61 [0] : vector<128x128xf32> to vector<128xf32>
    %59 = vector.shape_cast %58 : vector<128xf32> to vector<1x128xf32>
    %60 = arith.addf %57, %59 : vector<1x128xf32>
    %c0_62 = arith.constant 0 : index
    %c0_63 = arith.constant 0 : index
    %c0_64 = arith.constant 0 : index
    %61 = vector.load %arg5[%c0_62, %c0_63, %c0_64] : memref<1x1x128xf32, #tpu.memory_space<vmem>>, vector<1x1x128xf32>
    %62 = vector.shape_cast %61 : vector<1x1x128xf32> to vector<1x128xf32>
    %63 = vector.shape_cast %60 : vector<1x128xf32> to vector<1x1x128xf32>
    tpu.vector_store %arg5[%c0_62, %c0_63, %c0_64], %63 {strides = array<i32>} : memref<1x1x128xf32, #tpu.memory_space<vmem>>, vector<1x1x128xf32>,
    %c0_65 = arith.constant 0 : index
    %c0_66 = arith.constant 0 : index
    %c0_67 = arith.constant 0 : index
    %64 = vector.load %arg6[%c0_65, %c0_66, %c0_67] : memref<1x1x128xf32, #tpu.memory_space<vmem>>, vector<1x1x128xf32>
    %65 = vector.shape_cast %64 : vector<1x1x128xf32> to vector<1x128xf32>
    %66 = arith.mulf %50, %50 : vector<128x128xf32>
    %cst_68 = arith.constant dense<0.000000e+00> : vector<128xf32>
    %67 = vector.multi_reduction <add>, %66, %cst_68 [0] : vector<128x128xf32> to vector<128xf32>
    %68 = vector.shape_cast %67 : vector<128xf32> to vector<1x128xf32>
    %69 = arith.addf %65, %68 : vector<1x128xf32>
    %c0_69 = arith.constant 0 : index
    %c0_70 = arith.constant 0 : index
    %c0_71 = arith.constant 0 : index
    %70 = vector.load %arg6[%c0_69, %c0_70, %c0_71] : memref<1x1x128xf32, #tpu.memory_space<vmem>>, vector<1x1x128xf32>
    %71 = vector.shape_cast %70 : vector<1x1x128xf32> to vector<1x128xf32>
    %72 = vector.shape_cast %69 : vector<1x128xf32> to vector<1x1x128xf32>
    tpu.vector_store %arg6[%c0_69, %c0_70, %c0_71], %72 {strides = array<i32>} : memref<1x1x128xf32, #tpu.memory_space<vmem>>, vector<1x1x128xf32>,
    return
  }
  func.func @transform_0(%arg0: i32, %arg1: i32) -> (i32, i32, i32, i32) {
    %c0_i32 = arith.constant 0 : i32
    %c0_i32_0 = arith.constant 0 : i32
    %c0_i32_1 = arith.constant 0 : i32
    %c0_i32_2 = arith.constant 0 : i32
    return %arg0, %c0_i32, %c0_i32_0, %c0_i32_1 : i32, i32, i32, i32
  }
  func.func @transform_1(%arg0: i32, %arg1: i32) -> (i32, i32) {
    %c0_i32 = arith.constant 0 : i32
    %c0_i32_0 = arith.constant 0 : i32
    %c0_i32_1 = arith.constant 0 : i32
    return %c0_i32, %c0_i32_0 : i32, i32
  }
  func.func @transform_2(%arg0: i32, %arg1: i32) -> (i32, i32) {
    %c2_i32 = arith.constant 2 : i32
    %0 = arith.muli %arg0, %c2_i32 : i32
    %1 = arith.addi %0, %arg1 : i32
    %c0_i32 = arith.constant 0 : i32
    %c0_i32_0 = arith.constant 0 : i32
    return %1, %c0_i32 : i32, i32
  }
  func.func @transform_3(%arg0: i32, %arg1: i32) -> (i32, i32, i32) {
    %c0_i32 = arith.constant 0 : i32
    %c0_i32_0 = arith.constant 0 : i32
    %c0_i32_1 = arith.constant 0 : i32
    return %arg0, %c0_i32, %c0_i32_0 : i32, i32, i32
  }
  func.func @transform_4(%arg0: i32, %arg1: i32) -> (i32, i32, i32) {
    %c0_i32 = arith.constant 0 : i32
    %c0_i32_0 = arith.constant 0 : i32
    %c0_i32_1 = arith.constant 0 : i32
    return %arg0, %c0_i32, %c0_i32_0 : i32, i32, i32
  }
}

module attributes {stable_mosaic.version = 11 : i64} {
  func.func @_bn_relu_nchw_kernel(%arg0: i32, %arg1: i32, %arg2: memref<128x128xbf16, #tpu.memory_space<vmem>>, %arg3: memref<1x128xf32, #tpu.memory_space<vmem>>, %arg4: memref<1x128xf32, #tpu.memory_space<vmem>>, %arg5: memref<1x8x128xf32, #tpu.memory_space<vmem>>) attributes {dimension_semantics = [#tpu.dimension_semantics<parallel>, #tpu.dimension_semantics<parallel>], iteration_bounds = array<i64: 2, 2>, scalar_prefetch = 0 : i64, scratch_operands = 0 : i64, tpu.core_type = #tpu.core_type<tc>, window_params = [{transform_indices = @transform_0, window_bounds = array<i64: 128, 128>}, {pipeline_mode = #tpu.pipeline_mode<synchronous>, transform_indices = @transform_1, window_bounds = array<i64: 1, 128>}, {pipeline_mode = #tpu.pipeline_mode<synchronous>, transform_indices = @transform_2, window_bounds = array<i64: 1, 128>}, {transform_indices = @transform_3, window_bounds = array<i64: 1, 8, 128>}]} {
    %c0 = arith.constant 0 : index
    %c0_0 = arith.constant 0 : index
    %0 = vector.load %arg2[%c0, %c0_0] : memref<128x128xbf16, #tpu.memory_space<vmem>>, vector<128x128xbf16>
    %1 = arith.extf %0 : vector<128x128xbf16> to vector<128x128xf32>
    %c0_1 = arith.constant 0 : index
    %c0_2 = arith.constant 0 : index
    %2 = vector.load %arg3[%c0_1, %c0_2] : memref<1x128xf32, #tpu.memory_space<vmem>>, vector<1x128xf32>
    %3 = vector.broadcast %2 : vector<1x128xf32> to vector<128x128xf32>
    %4 = arith.mulf %1, %3 : vector<128x128xf32>
    %c0_3 = arith.constant 0 : index
    %c0_4 = arith.constant 0 : index
    %5 = vector.load %arg4[%c0_3, %c0_4] : memref<1x128xf32, #tpu.memory_space<vmem>>, vector<1x128xf32>
    %6 = vector.broadcast %5 : vector<1x128xf32> to vector<128x128xf32>
    %7 = arith.addf %4, %6 : vector<128x128xf32>
    %cst = arith.constant 0.000000e+00 : f32
    %8 = vector.broadcast %cst : f32 to vector<128x128xf32>
    %9 = arith.maximumf %7, %8 : vector<128x128xf32>
    %10 = tpu.transpose %9, [1, 0] : vector<128x128xf32> -> vector<128x128xf32>
    %11 = vector.extract_strided_slice %10 {offsets = [0, 0], sizes = [8, 128], strides = [1, 1]} : vector<128x128xf32> to vector<8x128xf32>
    %c0_5 = arith.constant 0 : index
    %c0_6 = arith.constant 0 : index
    %c0_7 = arith.constant 0 : index
    %12 = vector.load %arg5[%c0_5, %c0_6, %c0_7] : memref<1x8x128xf32, #tpu.memory_space<vmem>>, vector<1x8x128xf32>
    %13 = vector.shape_cast %12 : vector<1x8x128xf32> to vector<8x128xf32>
    %14 = vector.shape_cast %11 : vector<8x128xf32> to vector<1x8x128xf32>
    tpu.vector_store %arg5[%c0_5, %c0_6, %c0_7], %14 {strides = array<i32>} : memref<1x8x128xf32, #tpu.memory_space<vmem>>, vector<1x8x128xf32>,
    return
  }
  func.func @transform_0(%arg0: i32, %arg1: i32) -> (i32, i32) {
    %c2_i32 = arith.constant 2 : i32
    %0 = arith.muli %arg0, %c2_i32 : i32
    %1 = arith.addi %0, %arg1 : i32
    %c0_i32 = arith.constant 0 : i32
    %c0_i32_0 = arith.constant 0 : i32
    return %1, %c0_i32 : i32, i32
  }
  func.func @transform_1(%arg0: i32, %arg1: i32) -> (i32, i32) {
    %c0_i32 = arith.constant 0 : i32
    %c0_i32_0 = arith.constant 0 : i32
    %c0_i32_1 = arith.constant 0 : i32
    return %c0_i32, %c0_i32_0 : i32, i32
  }
  func.func @transform_2(%arg0: i32, %arg1: i32) -> (i32, i32) {
    %c0_i32 = arith.constant 0 : i32
    %c0_i32_0 = arith.constant 0 : i32
    %c0_i32_1 = arith.constant 0 : i32
    return %c0_i32, %c0_i32_0 : i32, i32
  }
  func.func @transform_3(%arg0: i32, %arg1: i32) -> (i32, i32, i32) {
    %c0_i32 = arith.constant 0 : i32
    %c0_i32_0 = arith.constant 0 : i32
    return %arg0, %c0_i32, %arg1 : i32, i32, i32
  }
}

</mosaic_0001>

<bundles_post_ra>
// kernel: convolution_forward.3
= control target key start
LH: loop header
LB: loop body
LE: loop exit
PB: predicated region body
PF: predicated region fallthrough
CT: control target
= control target key end

     0   :  { %s569_s12 = smov 0   ;;  %s571_s13 = smov 0   ;;  %s682_s0 = inlined_call_operand.vmem [shape: bf16[512,128], index: 0, kind: input, shape index: {}]   ;;  %s683_s1 = inlined_call_operand.vmem [shape: f32[1,128], index: 1, kind: input, shape index: {}]   ;;  %s684_s2 = inlined_call_operand.vmem [shape: f32[1,128], index: 2, kind: input, shape index: {}]   ;;  %s685_s3 = inlined_call_operand.vmem [shape: f32[2,8,256], index: 3, kind: output, shape index: {}]  }
   0x1   :  { %s573_s14 = smov 0   ;;  %s575_s15 = smov 0  }
   0x2   :  { %s577_s16 = smov 0  }
   0x3 LB: > { %s22_s17 = sadd.s32 1, %s539_s14  ;;  %s25_s18 = sadd.s32 1, %s543_s15  ;;  %s547_s16 = sphi %s577_s16, %s13_s16   ;;  %s543_s15 = sphi %s575_s15, %s689_s15   ;;  %s539_s14 = sphi %s573_s14, %s688_s14   ;;  %s535_s13 = sphi %s571_s13, %s687_s13   ;;  %s531_s12 = sphi %s569_s12, %s686_s12  }
   0x4   : > { %p23_p0 = scmp.ge.s32.totalorder %s22_s17, 2  ;;  %p420_p1 = scmp.ge.s32.totalorder %s547_s16, 1 }
   0x5   : > { %p160_p2 = scmp.lt.s32.totalorder %s547_s16, 5 }
   0x6   : > { %s691_s17 = smov (%p23_p0, %s22_s17), 0  ;;  %s693_s18 = smov (!%p23_p0, %s25_s18), %s543_s15 }
   0x7   : > { %p161_p3 = pnand %p420_p1, %p160_p2  ;;  %p27_p4 = scmp.ge.s32.totalorder %s693_s18, 2 }
   0x8   : > { %s421_s19 = sshll.u32 (!%p161_p3), %s535_s13, 1  ;;  %v614_v1 = vld [vmem:[%s683_s1] ss:$0 sm:$0xff] (!%p161_p3)  ;;  %p199_p6 = scmp.lt.s32.totalorder (!%p161_p3), %s535_s13, 1 }
   0x9   : > { %s695_s18 = smov (%p27_p4, %s693_s18), 0  ;;  %164 = sbr.rel (%p161_p3) target bundleno = 158 (0x9e), region = 32 }
   0xa   : > { %s190_s20 = sadd.s32 (!%p161_p3), %s531_s12, %s421_s19  ;;  %v620_v6 = vld [vmem:[%s684_s2] ss:$0 sm:$0xff] (!%p161_p3)  ;;  %p201_p7 = scmp.lt.s32.totalorder (!%p161_p3), %s531_s12, 1 }
   0xb   : > { %s422_s21 = sshll.u32 (!%p161_p3), %s190_s20, 4 }
   0xc   : > { %p192_p5 = scmp.lt.s32.totalorder (!%p161_p3), %s422_s21, 63 }
  0x10   : > { %s697_s21 = smov (!%p192_p5, %s422_s21), 63  ;;  %s699_s13 = smov (!%p199_p6, %s535_s13), 1 }
  0x11   : > { %s423_s22 = sshll.u32 %s697_s21, 2  ;;  %s701_s12 = smov (!%p201_p7, %s531_s12), 1 }
  0x12   : > { %s608_s25 = scalar_lea.vmem %s682_s0, %s423_s22  ;;  %s424_s30 = sshll.u32 %s699_s13, 1 }
  0x13   : > { %v431_v0 = vld [vmem:[%s608_s25] sm:$0xff]   ;;  %v462_v2 = vld [vmem:[%s608_s25 + $0x8] sm:$0xff]   ;;  %v463_v13 = vld [vmem:[%s608_s25 + $0x10] sm:$0xff]   ;;  %s204_s4 = sadd.s32 %s424_s30, %s701_s12 }
  0x14   : > { %v432_v3 = vunpack.c.l.bf16 %v431_v0  ;;  %v433_v4 = vunpack.c.h.bf16 %v431_v0  ;;  %v436_v5 = vunpack.c.l.bf16 %v462_v2  ;;  %v437_v12 = vunpack.c.h.bf16 %v462_v2  ;;  %v464_v23 = vld [vmem:[%s608_s25 + $0x18] sm:$0xff]   ;;  %v465_v32 = vld [vmem:[%s608_s25 + $0x20] sm:$0xff]   ;;  %v466_v41 = vld [vmem:[%s608_s25 + $0x28] sm:$0xff]   ;;  %s425_s5 = sshll.u32 %s204_s4, 3 }
  0x15   : > { %v440_v18 = vunpack.c.l.bf16 %v463_v13  ;;  %v441_v22 = vunpack.c.h.bf16 %v463_v13  ;;  %v444_v27 = vunpack.c.l.bf16 %v464_v23  ;;  %v445_v31 = vunpack.c.h.bf16 %v464_v23  ;;  %v467_v50 = vld [vmem:[%s608_s25 + $0x30] sm:$0xff]   ;;  %v468_v59 = vld [vmem:[%s608_s25 + $0x38] sm:$0xff]   ;;  %s206_s8 = scalar_lea.vmem %s685_s3, %s425_s5 }
  0x16   : > { %v246_v7 = vmul.f32 %v432_v3, %v614_v1  ;;  %v247_v8 = vmul.f32 %v433_v4, %v614_v1  ;;  %v248_v11 = vmul.f32 %v436_v5, %v614_v1  ;;  %v249_v17 = vmul.f32 %v437_v12, %v614_v1 }
  0x17   : > { %v250_v21 = vmul.f32 %v440_v18, %v614_v1  ;;  %v251_v26 = vmul.f32 %v441_v22, %v614_v1  ;;  %v252_v30 = vmul.f32 %v444_v27, %v614_v1  ;;  %v253_v35 = vmul.f32 %v445_v31, %v614_v1 }
  0x18   : > { %v269_v9 = vadd.f32 %v620_v6, %v246_v7  ;;  %v270_v10 = vadd.f32 %v620_v6, %v247_v8  ;;  %v271_v16 = vadd.f32 %v620_v6, %v248_v11  ;;  %v272_v20 = vadd.f32 %v620_v6, %v249_v17 }
  0x19   : > { %v273_v25 = vadd.f32 %v620_v6, %v250_v21  ;;  %v274_v29 = vadd.f32 %v620_v6, %v251_v26  ;;  %v275_v34 = vadd.f32 %v620_v6, %v252_v30  ;;  %v448_v36 = vunpack.c.l.bf16 %v465_v32 }
  0x1a   : > { %v285_v14 = vmax.f32 %v269_v9, 0.0  ;;  %v286_v15 = vmax.f32 %v270_v10, 0.0  ;;  %v287_v19 = vmax.f32 %v271_v16, 0.0  ;;  %v288_v24 = vmax.f32 %v272_v20, 0.0 }
  0x1b   : > { %v289_v28 = vmax.f32 %v273_v25, 0.0  ;;  %v290_v33 = vmax.f32 %v274_v29, 0.0  ;;  %v291_v37 = vmax.f32 %v275_v34, 0.0  ;;  %v276_v38 = vadd.f32 %v620_v6, %v253_v35 }
  0x1c   : > { %301 = vxpose.xlu0.b32.start [1/16] (narrow) %v285_v14, 8  ;;  %v254_v39 = vmul.f32 %v448_v36, %v614_v1  ;;  %v449_v40 = vunpack.c.h.bf16 %v465_v32  ;;  %v452_v45 = vunpack.c.l.bf16 %v466_v41  ;;  %v453_v49 = vunpack.c.h.bf16 %v466_v41 }
  0x1d   : > { %v292_v42 = vmax.f32 %v276_v38, 0.0  ;;  %v456_v54 = vunpack.c.l.bf16 %v467_v50  ;;  %v457_v58 = vunpack.c.h.bf16 %v467_v50  ;;  %v460_v63 = vunpack.c.l.bf16 %v468_v59 }
  0x1e   : > { %v277_v43 = vadd.f32 %v620_v6, %v254_v39  ;;  %v255_v44 = vmul.f32 %v449_v40, %v614_v1  ;;  %v256_v48 = vmul.f32 %v452_v45, %v614_v1  ;;  %v257_v53 = vmul.f32 %v453_v49, %v614_v1 }
  0x1f   : > { %v258_v57 = vmul.f32 %v456_v54, %v614_v1  ;;  %v259_v62 = vmul.f32 %v457_v58, %v614_v1  ;;  %v260_v3 = vmul.f32 %v460_v63, %v614_v1  ;;  %v461_v4 = vunpack.c.h.bf16 %v468_v59 }
  0x20   : > { %302 = vxpose.xlu0.b32.cont [2/16] (narrow) %v286_v15, 8  ;;  %v293_v46 = vmax.f32 %v277_v43, 0.0  ;;  %v278_v47 = vadd.f32 %v620_v6, %v255_v44  ;;  %v279_v52 = vadd.f32 %v620_v6, %v256_v48  ;;  %v280_v56 = vadd.f32 %v620_v6, %v257_v53 }
  0x21   : > { %v281_v61 = vadd.f32 %v620_v6, %v258_v57  ;;  %v282_v2 = vadd.f32 %v620_v6, %v259_v62  ;;  %v283_v7 = vadd.f32 %v620_v6, %v260_v3  ;;  %v261_v8 = vmul.f32 %v461_v4, %v614_v1 }
  0x22   : > { %v294_v51 = vmax.f32 %v278_v47, 0.0  ;;  %v295_v55 = vmax.f32 %v279_v52, 0.0  ;;  %v296_v60 = vmax.f32 %v280_v56, 0.0 }
  0x23   : > { %v297_v0 = vmax.f32 %v281_v61, 0.0  ;;  %v298_v5 = vmax.f32 %v282_v2, 0.0  ;;  %v299_v9 = vmax.f32 %v283_v7, 0.0  ;;  %v284_v10 = vadd.f32 %v620_v6, %v261_v8 }
  0x24   : > { %303 = vxpose.xlu0.b32.cont [3/16] (narrow) %v287_v19, 8 }
  0x25   : > { %v300_v11 = vmax.f32 %v284_v10, 0.0 }
  0x28   : > { %304 = vxpose.xlu0.b32.cont [4/16] (narrow) %v288_v24, 8 }
  0x2c   : > { %305 = vxpose.xlu0.b32.cont [5/16] (narrow) %v289_v28, 8 }
  0x30   : > { %306 = vxpose.xlu0.b32.cont [6/16] (narrow) %v290_v33, 8 }
  0x34   : > { %307 = vxpose.xlu0.b32.cont [7/16] (narrow) %v291_v37, 8 }
  0x38   : > { %308 = vxpose.xlu0.b32.cont [8/16] (narrow) %v292_v42, 8 }
  0x3c   : > { %309 = vxpose.xlu0.b32.cont [9/16] (narrow) %v293_v46, 8 }
  0x40   : > { %310 = vxpose.xlu0.b32.cont [10/16] (narrow) %v294_v51, 8 }
  0x44   : > { %311 = vxpose.xlu0.b32.cont [11/16] (narrow) %v295_v55, 8 }
  0x48   : > { %312 = vxpose.xlu0.b32.cont [12/16] (narrow) %v296_v60, 8 }
  0x4c   : > { %313 = vxpose.xlu0.b32.cont [13/16] (narrow) %v297_v0, 8 }
  0x50   : > { %314 = vxpose.xlu0.b32.cont [14/16] (narrow) %v298_v5, 8 }
  0x54   : > { %315 = vxpose.xlu0.b32.cont [15/16] (narrow) %v299_v9, 8 }
  0x58   : > { %316 = vxpose.xlu0.b32.end [16/16] (narrow) %v300_v11, 8 }
  0x9c   : > { %v317_v12 = vpop.trf.xlu0 }
  0x9d   : > { %333 = vst [vmem:[%s206_s8] sm:$0xff] %v317_v12 }
  0x9e PF: > { %s13_s16 = sadd.s32 1, %s547_s16   ;;  %s686_s12 = smov %s539_s14 }
  0x9f   : > { %p10_p8 = scmp.ge.s32.totalorder %s13_s16, 6   ;;  %s687_s13 = smov %s543_s15 }
  0xa0   : > { %s688_s14 = smov %s691_s17  ;;  %s689_s15 = smov %s695_s18 }
  0xa1   :  { %12 = sbr.rel (!%p10_p8) target bundleno = 3 (0x3), region = 62 }

// kernel: convolution_forward.2
= control target key start
LH: loop header
LB: loop body
LE: loop exit
PB: predicated region body
PF: predicated region fallthrough
CT: control target
= control target key end

     0   :  { %s2676_s15 = smov 0   ;;  %s2678_s16 = smov 0   ;;  %s3097_s0 = inlined_call_operand.vmem [shape: bf16[2,18,18,4], index: 0, kind: input, shape index: {}]   ;;  %s3098_s1 = inlined_call_operand.vmem [shape: bf16[36,128], index: 1, kind: input, shape index: {}]   ;;  %s3099_s2 = inlined_call_operand.vmem [shape: bf16[512,128], index: 2, kind: output, shape index: {0}]   ;;  %s3100_s3 = inlined_call_operand.vmem [shape: f32[2,1,128], index: 3, kind: output, shape index: {1}]   ;;  %s3101_s4 = inlined_call_operand.vmem [shape: f32[2,1,128], index: 4, kind: output, shape index: {2}]  }
   0x1   :  { %s2680_s17 = smov 0   ;;  %s2682_s18 = smov 0  }
   0x2   :  { %s2684_s19 = smov 0  }
   0x3 LB: > { %s24_s20 = sadd.s32 1, %s2632_s17  ;;  %s27_s21 = sadd.s32 1, %s2636_s18  ;;  %s2640_s19 = sphi %s2684_s19, %s15_s19   ;;  %s2636_s18 = sphi %s2682_s18, %s3105_s18   ;;  %s2632_s17 = sphi %s2680_s17, %s3104_s17   ;;  %s2628_s16 = sphi %s2678_s16, %s3103_s16   ;;  %s2624_s15 = sphi %s2676_s15, %s3102_s15  }
   0x4   : > { %p25_p0 = scmp.ge.s32.totalorder %s24_s20, 2  ;;  %p2034_p1 = scmp.ge.s32.totalorder %s2640_s19, 1 }
   0x5   : > { %p183_p2 = scmp.lt.s32.totalorder %s2640_s19, 5 }
   0x6   : > { %s3107_s20 = smov (%p25_p0, %s24_s20), 0  ;;  %s3109_s21 = smov (!%p25_p0, %s27_s21), %s2636_s18 }
   0x7   : > { %p184_p3 = pnand %p2034_p1, %p183_p2  ;;  %p29_p4 = scmp.ge.s32.totalorder %s3109_s21, 2 }
   0x8   : > { %p217_p5 = scmp.lt.s32.totalorder (!%p184_p3), %s2628_s16, 1  ;;  %s2324_s23 = smul.u32 (!%p184_p3), 96, %s2624_s15  ;;  %vm622_vm0 = vcmask (!%p184_p3), 1046528   ;;  %vm404_vm1 = vsmask.f32 (!%p184_p3), 7424  ;;  %vm307_vm2 = vcmask (!%p184_p3), 31744  }
   0x9   : > { %s3111_s21 = smov (%p29_p4, %s3109_s21), 0  ;;  %187 = sbr.rel (%p184_p3) target bundleno = 537 (0x219), region = 28 }
   0xa   : > { %s2642_s9 = smov (!%p184_p3), 12   ;;  %s2643_s10 = smov (!%p184_p3), 8   ;;  %vm525_vm3 = vcmask (!%p184_p3), 64544   ;;  %vm671_vm4 = vcmask (!%p184_p3), 97344   ;;  %vm764_vm5 = vcmask (!%p184_p3), 130144   ;;  %vm1643_vm6 = vcmask (!%p184_p3), 1041408  }
   0xb   : > { %s2644_s11 = smov (!%p184_p3), 4   ;;  %s2645_s12 = smov (!%p184_p3), 16   ;;  %vm981_vm7 = vcmask (!%p184_p3), 162944   ;;  %vm1126_vm8 = vcmask (!%p184_p3), 195744   ;;  %vm1219_vm9 = vcmask (!%p184_p3), 228544   ;;  %vm1436_vm10 = vcmask (!%p184_p3), 261344  }
   0xc   : > { %s2646_s13 = smov (!%p184_p3), 20   ;;  %s2647_s14 = smov (!%p184_p3), 24   ;;  %vm1581_vm11 = vcmask (!%p184_p3), 294144   ;;  %vm1618_vm12 = vcmask (!%p184_p3), 293888  }
   0xd   : > { %s2036_s6 = sshll.u32 (!%p184_p3), %s2628_s16, 1  ;;  %p2321_p7 = scmp.ne.s32.totalorder (!%p184_p3), %s2624_s15, 0 }
  0x10   : > { %s218_s22 = scalar_select %p217_p5, %s2628_s16, 1 }
  0x12   : > { %s2429_s24 = smul.u32 216, %s218_s22  ;;  %s2716_s27 = scalar_lea.vmem %s3100_s3, %s218_s22 }
  0x13   : > { %s2721_s30 = scalar_lea.vmem %s3101_s4, %s218_s22  ;;  %s2648_s22 = smov 28  }
  0x14   : > { %s221_s7 = scalar_lea.vmem %s3097_s0, %s2429_s24 }
  0x15   : > { %s2726_s8 = scalar_lea.vmem %s221_s7, %s2324_s23  ;;  %s2649_s23 = smov 32  }
  0x16   : > { %v2479_v0 = vld [vmem:[%s2726_s8 + $0x3c] sm:$0xff]   ;;  %v2480_v1 = vld [vmem:[%s2726_s8 + $0xc] sm:$0xff]   ;;  %v2482_v3 = vld [vmem:[%s2726_s8 + $0x38] ss:$0 sps:$4 sm:$0x11]   ;;  %s223_s7 = sadd.s32 %s2624_s15, %s2036_s6 }
  0x17   : > { %748 = vrot.lane.b32.xlu1 %v2479_v0, %s2642_s9  ;;  %740 = vrot.lane.b32.xlu0 %v2480_v1, %s2642_s9  ;;  %v2481_v2 = vld [vmem:[%s2726_s8 + $0x30] sm:$0xfe]   ;;  %v636_v6 = vrot.slane %v2482_v3, 1  ;;  %v2483_v7 = vld [vmem:[%s2726_s8] sm:$0xfe]  }
  0x18   : > { %v2489_v4 = vld [vmem:[%s2726_s8 + $0xc] sm:$0xff]   ;;  %v635_v5 = vrot.slane %v2481_v2, 1  ;;  %v2484_v8 = vld [vmem:[%s2726_s8 + $0x8] ss:$0 sps:$4 sm:$0x11]   ;;  %v623_v11 = vrot.slane %v2483_v7, 1 }
  0x19   : > { %v418_v9 = vshrl.u32 %v2489_v4, 16  ;;  %v2485_v12 = vld [vmem:[%s2726_s8 + $0x3c] sm:$0xfe]   ;;  %v420_v13 = vshll.u32 %v2489_v4, 16  ;;  %v624_v14 = vrot.slane %v2484_v8, 1  ;;  %v2495_v38 = vld [vmem:[%s2726_s8 + $0x30] sm:$0xff]  }
  0x1a   : > { %v637_v10 = vsel %vm622_vm0, %v635_v5, %v636_v6  ;;  %v2486_v15 = vld [vmem:[%s2726_s8 + $0x44] ss:$0 sps:$4 sm:$0x11]   ;;  %v638_v16 = vrot.slane %v2485_v12, 1  ;;  %v2487_v20 = vld [vmem:[%s2726_s8 + $0xc] sm:$0xfe]  }
  0x1b   : > { %655 = vrot.lane.b32.xlu1 %v637_v10, %s2643_s10  ;;  %v422_v17 = vrot.slane %v420_v13, 1  ;;  %v625_v18 = vsel %vm622_vm0, %v623_v11, %v624_v14  ;;  %v639_v19 = vrot.slane %v2486_v15, 1  ;;  %v2488_v21 = vld [vmem:[%s2726_s8 + $0x14] ss:$0 sps:$4 sm:$0x11]   ;;  %v626_v23 = vrot.slane %v2487_v20, 1 }
  0x1c   : > { %647 = vrot.lane.b32.xlu0 %v625_v18, %s2643_s10  ;;  %v627_v24 = vrot.slane %v2488_v21, 1  ;;  %v2490_v25 = vld [vmem:[%s2726_s8 + $0x14] ss:$0 sps:$4 sm:$0x11]   ;;  %v2491_v26 = vld [vmem:[%s2726_s8] sm:$0xff]   ;;  %v454_v47 = vshrl.u32 %v2495_v38, 16 }
  0x1d   : > { %v640_v22 = vsel %vm622_vm0, %v638_v16, %v639_v19  ;;  %v423_v27 = vor.u32 %v422_v17, %v418_v9  ;;  %v425_v29 = vshll.u32 %v2490_v25, 16  ;;  %v2492_v30 = vld [vmem:[%s2726_s8 + $0x8] ss:$0 sps:$4 sm:$0x11]   ;;  %v406_v31 = vshrl.u32 %v2491_v26, 16  ;;  %v2493_v36 = vld [vmem:[%s2726_s8 + $0x3c] sm:$0xff]  }
  0x1e   : > { %v628_v28 = vsel %vm622_vm0, %v626_v23, %v627_v24  ;;  %v408_v32 = vshll.u32 %v2491_v26, 16  ;;  %v413_v35 = vshll.u32 %v2492_v30, 16  ;;  %v2494_v37 = vld [vmem:[%s2726_s8 + $0x44] ss:$0 sps:$4 sm:$0x11]   ;;  %v466_v42 = vshrl.u32 %v2493_v36, 16 }
  0x1f   : > { %657 = vrot.lane.b32.xlu1 %v640_v22, %s2643_s10  ;;  %v427_v33 = vrot.slane %v425_v29, 1  ;;  %v468_v43 = vshll.u32 %v2493_v36, 16  ;;  %v473_v44 = vshll.u32 %v2494_v37, 16  ;;  %v2496_v45 = vld [vmem:[%s2726_s8 + $0x38] ss:$0 sps:$4 sm:$0x11]  }
  0x20   : > { %649 = vrot.lane.b32.xlu0 %v628_v28, %s2643_s10  ;;  %v410_v34 = vrot.slane %v408_v32, 1  ;;  %v415_v41 = vrot.slane %v413_v35, 1  ;;  %v456_v48 = vshll.u32 %v2495_v38, 16  ;;  %v461_v51 = vshll.u32 %v2496_v45, 16  ;;  %v2499_v53 = vld [vmem:[%s2726_s8 + $0x3c] sm:$0xff]   ;;  %v2497_v58 = vld [vmem:[%s2726_s8 + $0x48] sm:$0xff]  }
  0x21   : > { %v428_v39 = vsel %vm404_vm1, %v423_v27, %v427_v33  ;;  %v470_v49 = vrot.slane %v468_v43, 1  ;;  %v475_v50 = vrot.slane %v473_v44, 1  ;;  %v2500_v56 = vld [vmem:[%s2726_s8 + $0x44] ss:$0 sps:$4 sm:$0x11]   ;;  %v910_v59 = vshrl.u32 %v2499_v53, 16 }
  0x22   : > { %v411_v40 = vor.u32 %v410_v34, %v406_v31  ;;  %v458_v52 = vrot.slane %v456_v48, 1  ;;  %v463_v55 = vrot.slane %v461_v51, 1  ;;  %v912_v60 = vshll.u32 %v2499_v53, 16  ;;  %v2498_v62 = vld [vmem:[%s2726_s8 + $0x18] sm:$0xff]   ;;  %v2501_v0 = vld [vmem:[%s2726_s8 + $0xc] sm:$0xff]  }
  0x23   : > { %503 = vrot.lane.b32.xlu1 %v428_v39, %s2644_s11  ;;  %v471_v54 = vor.u32 %v470_v49, %v466_v42  ;;  %v917_v63 = vshll.u32 %v2500_v56, 16  ;;  %v2502_v3 = vld [vmem:[%s2726_s8 + $0x14] ss:$0 sps:$4 sm:$0x11]   ;;  %v862_v5 = vshrl.u32 %v2501_v0, 16  ;;  %v864_v6 = vshll.u32 %v2501_v0, 16 }
  0x24   : > { %v416_v46 = vsel %vm404_vm1, %v411_v40, %v415_v41  ;;  %v459_v57 = vor.u32 %v458_v52, %v454_v47  ;;  %v914_v2 = vrot.slane %v912_v60, 1  ;;  %v2503_v7 = vld [vmem:[%s2726_s8 + $0x48] sm:$0xff]   ;;  %v869_v9 = vshll.u32 %v2502_v3, 16  ;;  %v2504_v10 = vld [vmem:[%s2726_s8 + $0x50] ss:$0 sps:$4 sm:$0x11]  }
  0x25   : > { %501 = vrot.lane.b32.xlu0 %v416_v46, %s2644_s11  ;;  %v476_v61 = vsel %vm404_vm1, %v471_v54, %v475_v50  ;;  %v919_v4 = vrot.slane %v917_v63, 1  ;;  %v866_v11 = vrot.slane %v864_v6, 1  ;;  %v922_v12 = vshrl.u32 %v2503_v7, 16  ;;  %v2505_v14 = vld [vmem:[%s2726_s8 + $0x18] sm:$0xff]   ;;  %v2509_v34 = vld [vmem:[%s2726_s8 + $0xc] sm:$0xfe]  }
  0x26   : > { %v464_v1 = vsel %vm404_vm1, %v459_v57, %v463_v55  ;;  %v915_v8 = vor.u32 %v914_v2, %v910_v59  ;;  %v924_v13 = vshll.u32 %v2503_v7, 16  ;;  %v871_v16 = vrot.slane %v869_v9, 1  ;;  %v2506_v20 = vld [vmem:[%s2726_s8 + $0x20] ss:$0 sps:$4 sm:$0x11]   ;;  %v2519_v49 = vld [vmem:[%s2726_s8 + $0x48] sm:$0xff]  }
  0x27   : > { %511 = vrot.lane.b32.xlu1 %v476_v61, %s2644_s11  ;;  %v929_v17 = vshll.u32 %v2504_v10, 16  ;;  %v867_v18 = vor.u32 %v866_v11, %v862_v5  ;;  %v874_v21 = vshrl.u32 %v2505_v14, 16  ;;  %v876_v22 = vshll.u32 %v2505_v14, 16  ;;  %v2507_v28 = vld [vmem:[%s2726_s8 + $0x3c] sm:$0xfe]   ;;  %v2515_v53 = vld [vmem:[%s2726_s8 + $0x48] sm:$0xff]  }
  0x28   : > { %v920_v15 = vsel %vm404_vm1, %v915_v8, %v919_v4  ;;  %v926_v19 = vrot.slane %v924_v13, 1  ;;  %v881_v27 = vshll.u32 %v2506_v20, 16  ;;  %v2508_v29 = vld [vmem:[%s2726_s8 + $0x44] ss:$0 sps:$4 sm:$0x11]   ;;  %v1090_v33 = vrot.slane %v2507_v28, 1 }
  0x29   : > { %509 = vrot.lane.b32.xlu0 %v464_v1, %s2644_s11  ;;  %v931_v23 = vrot.slane %v929_v17, 1  ;;  %v872_v24 = vsel %vm404_vm1, %v867_v18, %v871_v16  ;;  %v878_v26 = vrot.slane %v876_v22, 1  ;;  %v1091_v35 = vrot.slane %v2508_v29, 1  ;;  %v2510_v36 = vld [vmem:[%s2726_s8 + $0x14] ss:$0 sps:$4 sm:$0x11]  }
  0x2a   : > { %v927_v25 = vor.u32 %v926_v19, %v922_v12  ;;  %v883_v32 = vrot.slane %v881_v27, 1  ;;  %v1078_v38 = vrot.slane %v2509_v34, 1  ;;  %v1079_v39 = vrot.slane %v2510_v36, 1  ;;  %v2511_v40 = vld [vmem:[%s2726_s8 + $0x48] sm:$0xfe]   ;;  %v2521_v52 = vld [vmem:[%s2726_s8 + $0x18] sm:$0xff]  }
  0x2b   : > { %750 = vrot.lane.b32.xlu1 %v2497_v58, %s2642_s9  ;;  %v879_v31 = vor.u32 %v878_v26, %v874_v21  ;;  %v2512_v41 = vld [vmem:[%s2726_s8 + $0x50] ss:$0 sps:$4 sm:$0x11]   ;;  %v1092_v42 = vsel %vm622_vm0, %v1090_v33, %v1091_v35  ;;  %v1093_v44 = vrot.slane %v2511_v40, 1  ;;  %v2513_v46 = vld [vmem:[%s2726_s8 + $0x18] sm:$0xfe]  }
  0x2c   : > { %v932_v30 = vsel %vm404_vm1, %v927_v25, %v931_v23  ;;  %v1080_v43 = vsel %vm622_vm0, %v1078_v38, %v1079_v39  ;;  %v1094_v45 = vrot.slane %v2512_v41, 1  ;;  %v2514_v47 = vld [vmem:[%s2726_s8 + $0x20] ss:$0 sps:$4 sm:$0x11]   ;;  %v1081_v48 = vrot.slane %v2513_v46, 1  ;;  %v2516_v55 = vld [vmem:[%s2726_s8 + $0x18] sm:$0xff]  }
  0x2d   : > { %742 = vrot.lane.b32.xlu0 %v2498_v62, %s2642_s9  ;;  %v884_v37 = vsel %vm404_vm1, %v879_v31, %v883_v32  ;;  %v1082_v51 = vrot.slane %v2514_v47, 1  ;;  %v1365_v56 = vshrl.u32 %v2519_v49, 16  ;;  %v1367_v57 = vshll.u32 %v2519_v49, 16  ;;  %v2520_v58 = vld [vmem:[%s2726_s8 + $0x50] ss:$0 sps:$4 sm:$0x11]  }
  0x2e   : > { %v1095_v50 = vsel %vm622_vm0, %v1093_v44, %v1094_v45  ;;  %v1317_v59 = vshrl.u32 %v2521_v52, 16  ;;  %v1319_v61 = vshll.u32 %v2521_v52, 16  ;;  %v2517_v62 = vld [vmem:[%s2726_s8 + $0x54] sm:$0xff]   ;;  %v1372_v63 = vshll.u32 %v2520_v58, 16  ;;  %v2518_v1 = vld [vmem:[%s2726_s8 + $0x24] sm:$0xff]  }
  0x2f   : > { %965 = vrot.lane.b32.xlu1 %v920_v15, %s2645_s12  ;;  %v1083_v54 = vsel %vm622_vm0, %v1081_v48, %v1082_v51  ;;  %v1369_v60 = vrot.slane %v1367_v57, 1  ;;  %v2522_v0 = vld [vmem:[%s2726_s8 + $0x20] ss:$0 sps:$4 sm:$0x11]   ;;  %v2523_v3 = vld [vmem:[%s2726_s8 + $0x54] sm:$0xff]   ;;  %v2525_v7 = vld [vmem:[%s2726_s8 + $0x24] sm:$0xff]  }
  0x30   : > { %v1321_v2 = vrot.slane %v1319_v61, 1  ;;  %v1374_v4 = vrot.slane %v1372_v63, 1  ;;  %v1324_v5 = vshll.u32 %v2522_v0, 16  ;;  %v2524_v6 = vld [vmem:[%s2726_s8 + $0x5c] ss:$0 sps:$4 sm:$0x11]  }
  0x31   : > { %957 = vrot.lane.b32.xlu0 %v872_v24, %s2645_s12  ;;  %v1370_v8 = vor.u32 %v1369_v60, %v1365_v56  ;;  %v1377_v9 = vshrl.u32 %v2523_v3, 16  ;;  %v1379_v10 = vshll.u32 %v2523_v3, 16  ;;  %v1384_v13 = vshll.u32 %v2524_v6, 16  ;;  %v2531_v14 = vld [vmem:[%s2726_s8 + $0x48] sm:$0xff]   ;;  %v2533_v32 = vld [vmem:[%s2726_s8 + $0x18] sm:$0xff]  }
  0x32   : > { %v1322_v11 = vor.u32 %v1321_v2, %v1317_v59  ;;  %v1326_v12 = vrot.slane %v1324_v5, 1  ;;  %v2526_v16 = vld [vmem:[%s2726_s8 + $0x2c] ss:$0 sps:$4 sm:$0x11]   ;;  %v1329_v17 = vshrl.u32 %v2525_v7, 16  ;;  %v1331_v18 = vshll.u32 %v2525_v7, 16 }
  0x33   : > { %967 = vrot.lane.b32.xlu1 %v932_v30, %s2645_s12  ;;  %v1381_v15 = vrot.slane %v1379_v10, 1  ;;  %v1386_v19 = vrot.slane %v1384_v13, 1  ;;  %v478_v20 = vshrl.u32 %v2531_v14, 16  ;;  %v1375_v21 = vsel %vm404_vm1, %v1370_v8, %v1374_v4  ;;  %v2527_v25 = vld [vmem:[%s2726_s8 + $0x48] sm:$0xfe]   ;;  %v2539_v52 = vld [vmem:[%s2726_s8 + $0x54] sm:$0xff]  }
  0x34   : > { %v1333_v23 = vrot.slane %v1331_v18, 1  ;;  %v1336_v24 = vshll.u32 %v2526_v16, 16  ;;  %v1327_v26 = vsel %vm404_vm1, %v1322_v11, %v1326_v12  ;;  %v2528_v27 = vld [vmem:[%s2726_s8 + $0x50] ss:$0 sps:$4 sm:$0x11]   ;;  %v480_v28 = vshll.u32 %v2531_v14, 16 }
  0x35   : > { %959 = vrot.lane.b32.xlu0 %v884_v37, %s2645_s12  ;;  %v1382_v22 = vor.u32 %v1381_v15, %v1377_v9  ;;  %v1545_v31 = vrot.slane %v2527_v25, 1  ;;  %v1546_v33 = vrot.slane %v2528_v27, 1  ;;  %v2529_v34 = vld [vmem:[%s2726_s8 + $0x18] sm:$0xfe]   ;;  %v430_v46 = vshrl.u32 %v2533_v32, 16  ;;  %v2541_v57 = vld [vmem:[%s2726_s8 + $0x24] sm:$0xff]  }
  0x36   : > { %v1334_v29 = vor.u32 %v1333_v23, %v1329_v17  ;;  %v1338_v30 = vrot.slane %v1336_v24, 1  ;;  %v2530_v35 = vld [vmem:[%s2726_s8 + $0x20] ss:$0 sps:$4 sm:$0x11]   ;;  %v1533_v38 = vrot.slane %v2529_v34, 1  ;;  %v482_v41 = vrot.slane %v480_v28, 1 }
  0x37   : > { %1110 = vrot.lane.b32.xlu1 %v1092_v42, %s2646_s13  ;;  %v1387_v36 = vsel %vm404_vm1, %v1382_v22, %v1386_v19  ;;  %v1534_v39 = vrot.slane %v2530_v35, 1  ;;  %v2532_v40 = vld [vmem:[%s2726_s8 + $0x50] ss:$0 sps:$4 sm:$0x11]   ;;  %v1547_v44 = vsel %vm622_vm0, %v1545_v31, %v1546_v33  ;;  %v432_v47 = vshll.u32 %v2533_v32, 16  ;;  %v2555_v27 = vld [vmem:[%s2726_s8 + $0x54] sm:$0xff]  }
  0x38   : > { %v1339_v37 = vsel %vm404_vm1, %v1334_v29, %v1338_v30  ;;  %v485_v42 = vshll.u32 %v2532_v40, 16  ;;  %v483_v45 = vor.u32 %v482_v41, %v478_v20  ;;  %v2535_v51 = vld [vmem:[%s2726_s8 + $0x54] sm:$0xfe]   ;;  %v2537_v61 = vld [vmem:[%s2726_s8 + $0x24] sm:$0xfe]   ;;  %v490_v3 = vshrl.u32 %v2539_v52, 16 }
  0x39   : > { %1102 = vrot.lane.b32.xlu0 %v1080_v43, %s2646_s13  ;;  %v2534_v43 = vld [vmem:[%s2726_s8 + $0x20] ss:$0 sps:$4 sm:$0x11]   ;;  %v1535_v48 = vsel %vm622_vm0, %v1533_v38, %v1534_v39  ;;  %v1548_v56 = vrot.slane %v2535_v51, 1  ;;  %v1536_v0 = vrot.slane %v2537_v61, 1  ;;  %v492_v4 = vshll.u32 %v2539_v52, 16 }
  0x3a   : > { %v487_v49 = vrot.slane %v485_v42, 1  ;;  %v2540_v2 = vld [vmem:[%s2726_s8 + $0x5c] ss:$0 sps:$4 sm:$0x11]   ;;  %v442_v10 = vshrl.u32 %v2541_v57, 16  ;;  %v444_v11 = vshll.u32 %v2541_v57, 16 }
  0x3b   : > { %1112 = vrot.lane.b32.xlu1 %v1095_v50, %s2646_s13  ;;  %v437_v50 = vshll.u32 %v2534_v43, 16  ;;  %v497_v6 = vshll.u32 %v2540_v2, 16  ;;  %v2542_v7 = vld [vmem:[%s2726_s8 + $0x2c] ss:$0 sps:$4 sm:$0x11]   ;;  %v494_v9 = vrot.slane %v492_v4, 1 }
  0x3c   : > { %v488_v58 = vsel %vm404_vm1, %v483_v45, %v487_v49  ;;  %v449_v13 = vshll.u32 %v2542_v7, 16  ;;  %v446_v15 = vrot.slane %v444_v11, 1  ;;  %v2543_v16 = vld [vmem:[%s2726_s8 + $0x48] sm:$0xfe]   ;;  %v2545_v23 = vld [vmem:[%s2726_s8 + $0x18] sm:$0xfe]  }
  0x3d   : > { %1104 = vrot.lane.b32.xlu0 %v1083_v54, %s2646_s13  ;;  %v2536_v54 = vld [vmem:[%s2726_s8 + $0x5c] ss:$0 sps:$4 sm:$0x11]   ;;  %v499_v12 = vrot.slane %v497_v6, 1  ;;  %v495_v14 = vor.u32 %v494_v9, %v490_v3  ;;  %v2547_v30 = vld [vmem:[%s2726_s8 + $0x54] sm:$0xfe]  }
  0x3e   : > { %v1549_v60 = vrot.slane %v2536_v54, 1  ;;  %v2544_v17 = vld [vmem:[%s2726_s8 + $0x50] ss:$0 sps:$4 sm:$0x11]   ;;  %v451_v18 = vrot.slane %v449_v13, 1  ;;  %v447_v20 = vor.u32 %v446_v15, %v442_v10  ;;  %v644_v33 = vrot.slane %v2547_v30, 1 }
  0x3f   : > { %1203 = vrot.lane.b32.xlu1 %v2515_v53, %s2647_s14  ;;  %v434_v53 = vrot.slane %v432_v47, 1  ;;  %v500_v19 = vsel %vm404_vm1, %v495_v14, %v499_v12  ;;  %v642_v22 = vrot.slane %v2544_v17, 1  ;;  %v2546_v24 = vld [vmem:[%s2726_s8 + $0x20] ss:$0 sps:$4 sm:$0x11]   ;;  %v936_v40 = vshll.u32 %v2555_v27, 16 }
  0x40   : > { %v1550_v5 = vsel %vm622_vm0, %v1548_v56, %v1549_v60  ;;  %v452_v25 = vsel %vm404_vm1, %v447_v20, %v451_v18  ;;  %v630_v29 = vrot.slane %v2546_v24, 1  ;;  %v2548_v31 = vld [vmem:[%s2726_s8 + $0x5c] ss:$0 sps:$4 sm:$0x11]   ;;  %v2549_v35 = vld [vmem:[%s2726_s8 + $0x24] sm:$0xfe]  }
  0x41   : > { %1195 = vrot.lane.b32.xlu0 %v2516_v55, %s2647_s14  ;;  %v439_v55 = vrot.slane %v437_v50, 1  ;;  %v435_v59 = vor.u32 %v434_v53, %v430_v46  ;;  %v645_v34 = vrot.slane %v2548_v31, 1  ;;  %v632_v39 = vrot.slane %v2549_v35, 1  ;;  %v2551_v42 = vld [vmem:[%s2726_s8 + $0x54] sm:$0xff]   ;;  %v2557_v43 = vld [vmem:[%s2726_s8 + $0x24] sm:$0xff]  }
  0x42   : > { %v938_v46 = vrot.slane %v936_v40, 1  ;;  %v886_v47 = vshrl.u32 %v2557_v43, 16  ;;  %v888_v49 = vshll.u32 %v2557_v43, 16  ;;  %v2553_v50 = vld [vmem:[%s2726_s8 + $0x60] sm:$0xff]   ;;  %v2554_v51 = vld [vmem:[%s2726_s8 + $0x30] sm:$0xff]  }
  0x43   : > { %1205 = vrot.lane.b32.xlu1 %v2517_v62, %s2647_s14  ;;  %v2538_v62 = vld [vmem:[%s2726_s8 + $0x2c] ss:$0 sps:$4 sm:$0x11]   ;;  %v440_v63 = vsel %vm404_vm1, %v435_v59, %v439_v55  ;;  %v646_v38 = vsel %vm622_vm0, %v644_v33, %v645_v34  ;;  %v2559_v55 = vld [vmem:[%s2726_s8 + $0x60] sm:$0xff]   ;;  %v2563_v12 = vld [vmem:[%s2726_s8 + $0x54] sm:$0xfe]  }
  0x44   : > { %v2558_v53 = vld [vmem:[%s2726_s8 + $0x2c] ss:$0 sps:$4 sm:$0x11]   ;;  %v890_v54 = vrot.slane %v888_v49, 1  ;;  %v946_v60 = vshrl.u32 %v2559_v55, 16  ;;  %v2571_v40 = vld [vmem:[%s2726_s8 + $0x60] sm:$0xff]  }
  0x45   : > { %1197 = vrot.lane.b32.xlu0 %v2518_v1, %s2647_s14  ;;  %v1537_v1 = vrot.slane %v2538_v62, 1  ;;  %v2560_v59 = vld [vmem:[%s2726_s8 + $0x68] ss:$0 sps:$4 sm:$0x11]   ;;  %v948_v62 = vshll.u32 %v2559_v55, 16  ;;  %v2572_v43 = vld [vmem:[%s2726_s8 + $0x30] sm:$0xff]  }
  0x46   : > { %v891_v61 = vor.u32 %v890_v54, %v886_v47  ;;  %v2562_v2 = vld [vmem:[%s2726_s8 + $0x38] ss:$0 sps:$4 sm:$0x11]   ;;  %v2564_v13 = vld [vmem:[%s2726_s8 + $0x5c] ss:$0 sps:$4 sm:$0x11]  }
  0x47   : > { %1420 = vrot.lane.b32.xlu1 %v1375_v21, %s2648_s22  ;;  %v1538_v8 = vsel %vm622_vm0, %v1536_v0, %v1537_v1  ;;  %v641_v21 = vrot.slane %v2543_v16, 1  ;;  %v953_v1 = vshll.u32 %v2560_v59, 16  ;;  %v950_v3 = vrot.slane %v948_v62, 1  ;;  %v2565_v17 = vld [vmem:[%s2726_s8 + $0x24] sm:$0xfe]   ;;  %v2579_v49 = vld [vmem:[%s2726_s8 + $0x6c] sm:$0xff]  }
  0x48   : > { %v1096_v16 = vrot.slane %v2563_v12, 1  ;;  %v2566_v20 = vld [vmem:[%s2726_s8 + $0x2c] ss:$0 sps:$4 sm:$0x11]   ;;  %v2569_v30 = vld [vmem:[%s2726_s8 + $0x30] sm:$0xfe]  }
  0x49   : > { %1412 = vrot.lane.b32.xlu0 %v1327_v26, %s2648_s22  ;;  %v629_v26 = vrot.slane %v2545_v23, 1  ;;  %v643_v28 = vsel %vm622_vm0, %v641_v21, %v642_v22  ;;  %v955_v7 = vrot.slane %v953_v1, 1  ;;  %v951_v10 = vor.u32 %v950_v3, %v946_v60  ;;  %v2575_v23 = vld [vmem:[%s2726_s8 + $0x60] sm:$0xff]   ;;  %v2578_v47 = vld [vmem:[%s2726_s8 + $0x38] ss:$0 sps:$4 sm:$0x11]  }
  0x4a   : > { %v1084_v22 = vrot.slane %v2565_v17, 1  ;;  %v1085_v24 = vrot.slane %v2566_v20, 1  ;;  %v1389_v33 = vshrl.u32 %v2575_v23, 16  ;;  %v1087_v34 = vrot.slane %v2569_v30, 1 }
  0x4b   : > { %1422 = vrot.lane.b32.xlu1 %v1387_v36, %s2648_s22  ;;  %v631_v32 = vsel %vm622_vm0, %v629_v26, %v630_v29  ;;  %v2550_v36 = vld [vmem:[%s2726_s8 + $0x2c] ss:$0 sps:$4 sm:$0x11]   ;;  %v956_v18 = vsel %vm404_vm1, %v951_v10, %v955_v7  ;;  %v2568_v26 = vld [vmem:[%s2726_s8 + $0x68] ss:$0 sps:$4 sm:$0x11]  }
  0x4c   : > { %v633_v41 = vrot.slane %v2550_v36, 1  ;;  %v1100_v29 = vrot.slane %v2568_v26, 1  ;;  %v1086_v31 = vsel %vm622_vm0, %v1084_v22, %v1085_v24  ;;  %v1391_v35 = vshll.u32 %v2575_v23, 16  ;;  %v2587_v24 = vld [vmem:[%s2726_s8 + $0x6c] sm:$0xfe]  }
  0x4d   : > { %1414 = vrot.lane.b32.xlu0 %v1339_v37, %s2648_s22  ;;  %v934_v37 = vshrl.u32 %v2555_v27, 16  ;;  %v1403_v55 = vshll.u32 %v2579_v49, 16  ;;  %v1401_v59 = vshrl.u32 %v2579_v49, 16  ;;  %v2590_v30 = vld [vmem:[%s2726_s8 + $0x44] ss:$0 sps:$4 sm:$0x11]  }
  0x4e   : > { %v634_v45 = vsel %vm622_vm0, %v632_v39, %v633_v41  ;;  %v1393_v41 = vrot.slane %v1391_v35, 1  ;;  %v2594_v35 = vld [vmem:[%s2726_s8 + $0x30] sm:$0xff]  }
  0x4f   : > { %1565 = vrot.lane.b32.xlu1 %v1547_v44, %s2649_s23  ;;  %v2552_v44 = vld [vmem:[%s2726_s8 + $0x24] sm:$0xff]   ;;  %v939_v56 = vor.u32 %v938_v46, %v934_v37  ;;  %v2577_v37 = vld [vmem:[%s2726_s8 + $0x30] sm:$0xff]   ;;  %312 = vst.msk [vmem:[#allocation2 + $0x20] sm:$0xff] %vm307_vm2, %v2594_v35 }
  0x50   : > { %v1394_v54 = vor.u32 %v1393_v41, %v1389_v33 }
  0x51   : > { %1557 = vrot.lane.b32.xlu0 %v1535_v48, %s2649_s23  ;;  %v2556_v48 = vld [vmem:[%s2726_s8 + $0x5c] ss:$0 sps:$4 sm:$0x11]  }
  0x52   : > { %v941_v52 = vshll.u32 %v2556_v48, 16 }
  0x53   : > { %513 = vrot.lane.b32.xlu1 %v488_v58, %s2644_s11  ;;  %v893_v58 = vshll.u32 %v2558_v53, 16  ;;  %v2580_v53 = vld [vmem:[%s2726_s8 + $0x74] ss:$0 sps:$4 sm:$0x11]  }
  0x54   : > { %v943_v57 = vrot.slane %v941_v52, 1  ;;  %v1348_v52 = vshll.u32 %v2578_v47, 16  ;;  %v1408_v60 = vshll.u32 %v2580_v53, 16  ;;  %v2599_v47 = vld [vmem:[%s2726_s8 + $0x54] sm:$0xff]  }
  0x55   : > { %505 = vrot.lane.b32.xlu0 %v440_v63, %s2644_s11  ;;  %v2561_v63 = vld [vmem:[%s2726_s8 + $0x30] sm:$0xff]   ;;  %v895_v0 = vrot.slane %v893_v58, 1  ;;  %315 = vst.msk [vmem:[#allocation2 + $0x38] sm:$0xff] %vm307_vm2, %v2599_v47 }
  0x56   : > { %v898_v4 = vshrl.u32 %v2561_v63, 16  ;;  %v944_v6 = vsel %vm404_vm1, %v939_v56, %v943_v57  ;;  %v2581_v56 = vld [vmem:[%s2726_s8 + $0x3c] sm:$0xff]   ;;  %v1350_v62 = vrot.slane %v1348_v52, 1  ;;  %v1410_v10 = vrot.slane %v1408_v60, 1 }
  0x57   : > { %1567 = vrot.lane.b32.xlu1 %v1550_v5, %s2649_s23  ;;  %v900_v5 = vshll.u32 %v2561_v63, 16  ;;  %v896_v9 = vsel %vm404_vm1, %v891_v61, %v895_v0  ;;  %v2582_v61 = vld [vmem:[%s2726_s8 + $0x44] ss:$0 sps:$4 sm:$0x11]   ;;  %v1405_v0 = vrot.slane %v1403_v55, 1  ;;  %v1353_v1 = vshrl.u32 %v2581_v56, 16 }
  0x58   : > { %v1360_v3 = vshll.u32 %v2582_v61, 16 }
  0x59   : > { %1559 = vrot.lane.b32.xlu0 %v1538_v8, %s2649_s23  ;;  %v905_v8 = vshll.u32 %v2562_v2, 16  ;;  %v902_v11 = vrot.slane %v900_v5, 1  ;;  %v1355_v2 = vshll.u32 %v2581_v56, 16  ;;  %v2583_v5 = vld [vmem:[%s2726_s8 + $0x60] sm:$0xfe]  }
  0x5b   : > { %515 = vrot.lane.b32.xlu1 %v500_v19, %s2644_s11  ;;  %v907_v14 = vrot.slane %v905_v8, 1  ;;  %v903_v15 = vor.u32 %v902_v11, %v898_v4  ;;  %v1097_v19 = vrot.slane %v2564_v13, 1  ;;  %v1357_v4 = vrot.slane %v1355_v2, 1  ;;  %v2591_v11 = vld [vmem:[%s2726_s8 + $0xc] sm:$0xff]  }
  0x5c   : > { %309 = vst.msk [vmem:[#allocation2 + $0x8] sm:$0xff] %vm307_vm2, %v2591_v11 }
  0x5d   : > { %507 = vrot.lane.b32.xlu0 %v452_v25, %s2644_s11  ;;  %v908_v21 = vsel %vm404_vm1, %v903_v15, %v907_v14  ;;  %v2567_v25 = vld [vmem:[%s2726_s8 + $0x60] sm:$0xfe]   ;;  %v1098_v27 = vsel %vm622_vm0, %v1096_v16, %v1097_v19  ;;  %v1358_v13 = vor.u32 %v1357_v4, %v1353_v1  ;;  %v1362_v14 = vrot.slane %v1360_v3, 1  ;;  %v2585_v16 = vld [vmem:[%s2726_s8 + $0x30] sm:$0xfe]  }
  0x5e   : > { %v1551_v15 = vrot.slane %v2583_v5, 1  ;;  %v1539_v20 = vrot.slane %v2585_v16, 1 }
  0x5f   : > { %659 = vrot.lane.b32.xlu1 %v643_v28, %s2643_s10  ;;  %v1099_v28 = vrot.slane %v2567_v25, 1  ;;  %v2588_v25 = vld [vmem:[%s2726_s8 + $0x74] ss:$0 sps:$4 sm:$0x11]   ;;  %v1363_v26 = vsel %vm404_vm1, %v1358_v13, %v1362_v14 }
  0x61   : > { %651 = vrot.lane.b32.xlu0 %v631_v32, %s2643_s10  ;;  %v2570_v32 = vld [vmem:[%s2726_s8 + $0x38] ss:$0 sps:$4 sm:$0x11]  }
  0x62   : > { %v1088_v36 = vrot.slane %v2570_v32, 1 }
  0x63   : > { %661 = vrot.lane.b32.xlu1 %v646_v38, %s2643_s10  ;;  %v1101_v38 = vsel %vm622_vm0, %v1099_v28, %v1100_v29  ;;  %v1554_v28 = vrot.slane %v2587_v24, 1  ;;  %v2589_v29 = vld [vmem:[%s2726_s8 + $0x3c] sm:$0xfe]  }
  0x64   : > { %v1089_v39 = vsel %vm622_vm0, %v1087_v34, %v1088_v36  ;;  %v1555_v34 = vrot.slane %v2588_v25, 1 }
  0x65   : > { %653 = vrot.lane.b32.xlu0 %v634_v45, %s2643_s10  ;;  %v1343_v45 = vshll.u32 %v2577_v37, 16 }
  0x66   : > { %v1556_v41 = vsel %vm622_vm0, %v1554_v28, %v1555_v34 }
  0x67   : > { %752 = vrot.lane.b32.xlu1 %v2551_v42, %s2642_s9  ;;  %v1341_v42 = vshrl.u32 %v2577_v37, 16  ;;  %v1345_v48 = vrot.slane %v1343_v45, 1  ;;  %v1542_v37 = vrot.slane %v2589_v29, 1  ;;  %v2598_v45 = vld [vmem:[%s3098_s1 + $0x8] sm:$0xff]  }
  0x69   : > { %744 = vrot.lane.b32.xlu0 %v2552_v44, %s2642_s9  ;;  %v2576_v44 = vld [vmem:[%s2726_s8 + $0x68] ss:$0 sps:$4 sm:$0x11]   ;;  %v1346_v58 = vor.u32 %v1345_v48, %v1341_v42 }
  0x6a   : > { %v1396_v46 = vshll.u32 %v2576_v44, 16  ;;  %v2597_v44 = vld [vmem:[%s3098_s1] sm:$0xff]  }
  0x6b   : > { %754 = vrot.lane.b32.xlu1 %v2553_v50, %s2642_s9  ;;  %v2573_v50 = vld [vmem:[%s2726_s8 + $0x6c] sm:$0xff]   ;;  %v1351_v12 = vsel %vm404_vm1, %v1346_v58, %v1350_v62  ;;  %2399 = vmatprep.subr.bf16.mxu0 %v2597_v44  ;;  %v2600_v48 = vld [vmem:[%s2726_s8 + $0x24] sm:$0xff]  }
  0x6c   : > { %v1398_v57 = vrot.slane %v1396_v46, 1  ;;  %2421 = vmatprep.subr.bf16.mxu1 %v2597_v44  ;;  %2400 = vmatpush3.bf16.msra.mxu0 %v2597_v44  ;;  %311 = vst.msk [vmem:[#allocation2 + $0x18] sm:$0xff] %vm307_vm2, %v2600_v48 }
  0x6d   : > { %746 = vrot.lane.b32.xlu0 %v2554_v51, %s2642_s9  ;;  %v2574_v51 = vld [vmem:[%s2726_s8 + $0x3c] sm:$0xff]   ;;  %2424 = vmatpush3.bf16.msra.mxu1 %v2597_v44 }
  0x6e   : > { %v1399_v7 = vsel %vm404_vm1, %v1394_v54, %v1398_v57  ;;  %2401 = vmatprep.subr.bf16.mxu0 %v2598_v45  ;;  %2422 = vmatprep.subr.bf16.mxu1 %v2598_v45 }
  0x6f   : > { %969 = vrot.lane.b32.xlu1 %v944_v6, %s2645_s12  ;;  %v2584_v6 = vld [vmem:[%s2726_s8 + $0x68] ss:$0 sps:$4 sm:$0x11]  }
  0x70   : > { %v1552_v17 = vrot.slane %v2584_v6, 1  ;;  %2402 = vmatpush3.bf16.msra.mxu0 %v2598_v45 }
  0x71   : > { %961 = vrot.lane.b32.xlu0 %v896_v9, %s2645_s12  ;;  %v1406_v9 = vor.u32 %v1405_v0, %v1401_v59  ;;  %2425 = vmatpush3.bf16.msra.mxu1 %v2598_v45 }
  0x72   : > { %v1553_v32 = vsel %vm622_vm0, %v1551_v15, %v1552_v17 }
  0x73   : > { %971 = vrot.lane.b32.xlu1 %v956_v18, %s2645_s12  ;;  %v2586_v18 = vld [vmem:[%s2726_s8 + $0x38] ss:$0 sps:$4 sm:$0x11]   ;;  %v1411_v22 = vsel %vm404_vm1, %v1406_v9, %v1410_v10 }
  0x74   : > { %v1540_v23 = vrot.slane %v2586_v18, 1 }
  0x75   : > { %963 = vrot.lane.b32.xlu0 %v908_v21, %s2645_s12  ;;  %v2592_v21 = vld [vmem:[%s2726_s8] sm:$0xff]  }
  0x76   : > { %308 = vst.msk [vmem:[#allocation2] sm:$0xff] %vm307_vm2, %v2592_v21  ;;  %v1541_v36 = vsel %vm622_vm0, %v1539_v20, %v1540_v23 }
  0x77   : > { %1114 = vrot.lane.b32.xlu1 %v1098_v27, %s2646_s13 }
  0x79   : > { %1106 = vrot.lane.b32.xlu0 %v1086_v31, %s2646_s13  ;;  %v2593_v31 = vld [vmem:[%s2726_s8 + $0x3c] sm:$0xff]  }
  0x7a   : > { %313 = vst.msk [vmem:[#allocation2 + $0x28] sm:$0xff] %vm307_vm2, %v2593_v31 }
  0x7b   : > { %1116 = vrot.lane.b32.xlu1 %v1101_v38, %s2646_s13  ;;  %v1543_v38 = vrot.slane %v2590_v30, 1 }
  0x7d   : > { %1108 = vrot.lane.b32.xlu0 %v1089_v39, %s2646_s13  ;;  %v1544_v42 = vsel %vm622_vm0, %v1542_v37, %v1543_v38 }
  0x7f   : > { %1207 = vrot.lane.b32.xlu1 %v2571_v40, %s2647_s14  ;;  %v2595_v40 = vld [vmem:[%s2726_s8 + $0x48] sm:$0xff]  }
  0x80   : > { %314 = vst.msk [vmem:[#allocation2 + $0x30] sm:$0xff] %vm307_vm2, %v2595_v40 }
  0x81   : > { %1199 = vrot.lane.b32.xlu0 %v2572_v43, %s2647_s14  ;;  %v2596_v43 = vld [vmem:[%s2726_s8 + $0x18] sm:$0xff]   ;;  %s2037_s8 = sshll.u32 %s223_s7, 4 }
  0x82   : > { %310 = vst.msk [vmem:[#allocation2 + $0x10] sm:$0xff] %vm307_vm2, %v2596_v43  ;;  %p225_p6 = scmp.lt.s32.totalorder %s2037_s8, 63 }
  0x83   : > { %1209 = vrot.lane.b32.xlu1 %v2573_v50, %s2647_s14  ;;  %v2601_v50 = vld [vmem:[%s3098_s1 + $0x10] ss:$0 sps:$4 sm:$0x33]  }
  0x84   : > { %2427 = vmatprep.subr.msk.bf16.mxu0 %vm1643_vm6, %v2601_v50  ;;  %2428 = vmatprep.subr.msk.bf16.mxu1 %vm1643_vm6, %v2601_v50  ;;  %v1645_v53 = vsel %vm1643_vm6, %v2601_v50, 0  ;;  %s3113_s8 = smov (!%p225_p6, %s2037_s8), 63 }
  0x85   : > { %1201 = vrot.lane.b32.xlu0 %v2574_v51, %s2647_s14  ;;  %2404 = vmatpush3.bf16.msra.mxu0 %v1645_v53  ;;  %s2038_s9 = sshll.u32 %s3113_s8, 2 }
  0x86   : > { %2426 = vmatpush3.bf16.msra.mxu1 %v1645_v53  ;;  %s228_s12 = scalar_lea.vmem %s3099_s2, %s2038_s9 }
  0x87   : > { %1424 = vrot.lane.b32.xlu1 %v1399_v7, %s2648_s22 }
  0x89   : > { %v2926_v63 = vpop.permute.xlu1 %748  ;;  %v2933_v8 = vpop.permute.xlu0 %740  ;;  %1416 = vrot.lane.b32.xlu0 %v1351_v12, %s2648_s22 }
  0x8b   : > { %1426 = vrot.lane.b32.xlu1 %v1411_v22, %s2648_s22 }
  0x8d   : > { %v2941_v19 = vpop.permute.xlu1 %655  ;;  %1418 = vrot.lane.b32.xlu0 %v1363_v26, %s2648_s22 }
  0x8e   : > { %v648_v27 = vpop.permute.xlu0 %647 }
  0x8f   : > { %1569 = vrot.lane.b32.xlu1 %v1553_v32, %s2649_s23 }
  0x91   : > { %v658_v33 = vpop.permute.xlu1 %657  ;;  %1561 = vrot.lane.b32.xlu0 %v1541_v36, %s2649_s23 }
  0x92   : > { %v650_v39 = vpop.permute.xlu0 %649 }
  0x93   : > { %1571 = vrot.lane.b32.xlu1 %v1556_v41, %s2649_s23 }
  0x95   : > { %v504_v46 = vpop.permute.xlu1 %503  ;;  %1563 = vrot.lane.b32.xlu0 %v1544_v42, %s2649_s23 }
  0x96   : > { %527 = vst.msk [vmem:[#allocation2 + $0x8] sm:$0xff] %vm525_vm3, %v504_v46 }
  0x97   : > { %v502_v49 = vpop.permute.xlu0 %501  ;;  %673 = vst.msk [vmem:[#allocation2 + $0x8] sm:$0xff] %vm671_vm4, %v650_v39 }
  0x98   : > { %526 = vst.msk [vmem:[#allocation2] sm:$0xff] %vm525_vm3, %v502_v49 }
  0x99   : > { %672 = vst.msk [vmem:[#allocation2] sm:$0xff] %vm671_vm4, %v648_v27  ;;  %v512_v51 = vpop.permute.xlu1 %511 }
  0x9a   : > { %765 = vst.msk [vmem:[#allocation2] sm:$0xff] %vm764_vm5, %v2933_v8 }
  0x9b   : > { %531 = vst.msk [vmem:[#allocation2 + $0x28] sm:$0xff] %vm525_vm3, %v512_v51  ;;  %v510_v52 = vpop.permute.xlu0 %509 }
  0x9c   : > { %677 = vst.msk [vmem:[#allocation2 + $0x28] sm:$0xff] %vm671_vm4, %v658_v33 }
  0x9d   : > { %530 = vst.msk [vmem:[#allocation2 + $0x20] sm:$0xff] %vm525_vm3, %v510_v52  ;;  %v751_v54 = vpop.permute.xlu1 %750 }
  0x9e   : > { %676 = vst.msk [vmem:[#allocation2 + $0x20] sm:$0xff] %vm671_vm4, %v2941_v19 }
  0x9f   : > { %769 = vst.msk [vmem:[#allocation2 + $0x20] sm:$0xff] %vm764_vm5, %v2926_v63  ;;  %770 = vst.msk [vmem:[#allocation2 + $0x28] sm:$0xff] %vm764_vm5, %v751_v54  ;;  %v743_v55 = vpop.permute.xlu0 %742 }
  0xa0   : > { %766 = vst.msk [vmem:[#allocation2 + $0x8] sm:$0xff] %vm764_vm5, %v743_v55 }
  0xa1   : > { %v966_v56 = vpop.permute.xlu1 %965 }
  0xa2   : > { %986 = vst.msk [vmem:[#allocation2 + $0x20] sm:$0xff] %vm981_vm7, %v966_v56 }
  0xa3   : > { %v958_v57 = vpop.permute.xlu0 %957 }
  0xa4   : > { %982 = vst.msk [vmem:[#allocation2] sm:$0xff] %vm981_vm7, %v958_v57 }
  0xa5   : > { %v968_v58 = vpop.permute.xlu1 %967 }
  0xa6   : > { %987 = vst.msk [vmem:[#allocation2 + $0x28] sm:$0xff] %vm981_vm7, %v968_v58 }
  0xa7   : > { %v960_v59 = vpop.permute.xlu0 %959 }
  0xa8   : > { %983 = vst.msk [vmem:[#allocation2 + $0x8] sm:$0xff] %vm981_vm7, %v960_v59 }
  0xa9   : > { %v1111_v60 = vpop.permute.xlu1 %1110 }
  0xaa   : > { %1131 = vst.msk [vmem:[#allocation2 + $0x20] sm:$0xff] %vm1126_vm8, %v1111_v60 }
  0xab   : > { %v1103_v61 = vpop.permute.xlu0 %1102 }
  0xac   : > { %1127 = vst.msk [vmem:[#allocation2] sm:$0xff] %vm1126_vm8, %v1103_v61 }
  0xad   : > { %v1113_v62 = vpop.permute.xlu1 %1112 }
  0xae   : > { %1132 = vst.msk [vmem:[#allocation2 + $0x28] sm:$0xff] %vm1126_vm8, %v1113_v62 }
  0xaf   : > { %v1105_v63 = vpop.permute.xlu0 %1104 }
  0xb0   : > { %1128 = vst.msk [vmem:[#allocation2 + $0x8] sm:$0xff] %vm1126_vm8, %v1105_v63 }
  0xb1   : > { %v1204_v0 = vpop.permute.xlu1 %1203 }
  0xb2   : > { %1224 = vst.msk [vmem:[#allocation2 + $0x20] sm:$0xff] %vm1219_vm9, %v1204_v0 }
  0xb3   : > { %v1196_v1 = vpop.permute.xlu0 %1195 }
  0xb4   : > { %1220 = vst.msk [vmem:[#allocation2] sm:$0xff] %vm1219_vm9, %v1196_v1 }
  0xb5   : > { %v1206_v2 = vpop.permute.xlu1 %1205 }
  0xb6   : > { %1225 = vst.msk [vmem:[#allocation2 + $0x28] sm:$0xff] %vm1219_vm9, %v1206_v2 }
  0xb7   : > { %v1198_v3 = vpop.permute.xlu0 %1197 }
  0xb8   : > { %1221 = vst.msk [vmem:[#allocation2 + $0x8] sm:$0xff] %vm1219_vm9, %v1198_v3 }
  0xb9   : > { %v1421_v4 = vpop.permute.xlu1 %1420 }
  0xba   : > { %1441 = vst.msk [vmem:[#allocation2 + $0x20] sm:$0xff] %vm1436_vm10, %v1421_v4 }
  0xbb   : > { %v1413_v5 = vpop.permute.xlu0 %1412 }
  0xbc   : > { %1437 = vst.msk [vmem:[#allocation2] sm:$0xff] %vm1436_vm10, %v1413_v5 }
  0xbd   : > { %v1423_v6 = vpop.permute.xlu1 %1422 }
  0xbe   : > { %1442 = vst.msk [vmem:[#allocation2 + $0x28] sm:$0xff] %vm1436_vm10, %v1423_v6 }
  0xbf   : > { %v1415_v7 = vpop.permute.xlu0 %1414 }
  0xc0   : > { %1438 = vst.msk [vmem:[#allocation2 + $0x8] sm:$0xff] %vm1436_vm10, %v1415_v7 }
  0xc1   : > { %v1566_v8 = vpop.permute.xlu1 %1565 }
  0xc2   : > { %1586 = vst.msk [vmem:[#allocation2 + $0x20] sm:$0xff] %vm1581_vm11, %v1566_v8 }
  0xc3   : > { %v1558_v9 = vpop.permute.xlu0 %1557 }
  0xc4   : > { %1582 = vst.msk [vmem:[#allocation2] sm:$0xff] %vm1581_vm11, %v1558_v9 }
  0xc5   : > { %v514_v10 = vpop.permute.xlu1 %513 }
  0xc6   : > { %532 = vst.msk [vmem:[#allocation2 + $0x30] sm:$0xff] %vm525_vm3, %v514_v10 }
  0xc7   : > { %v506_v11 = vpop.permute.xlu0 %505 }
  0xc8   : > { %528 = vst.msk [vmem:[#allocation2 + $0x10] sm:$0xff] %vm525_vm3, %v506_v11 }
  0xc9   : > { %v1568_v12 = vpop.permute.xlu1 %1567  ;;  %v1594_v13 = vld [vmem:[#allocation2 + $0x20] sm:$0xff] }
  0xca   : > { %1587 = vst.msk [vmem:[#allocation2 + $0x28] sm:$0xff] %vm1581_vm11, %v1568_v12  ;;  %2413 = vmatprep.mubr.msk.bf16.mxu1 %vm1618_vm12, %v1594_v13  ;;  %v2650_v12 = vmov (!%p2321_p7), 0.0  }
  0xcb   : > { %v1560_v14 = vpop.permute.xlu0 %1559  ;;  %v1590_v15 = vld [vmem:[#allocation2] sm:$0xff]  ;;  %1828 = vst [vmem:[%s2716_s27] sm:$0x1] (!%p2321_p7), %v2650_v12  ;;  %1829 = vst [vmem:[%s2721_s30] sm:$0x1] (!%p2321_p7), %v2650_v12 }
  0xcc   : > { %1583 = vst.msk [vmem:[#allocation2 + $0x8] sm:$0xff] %vm1581_vm11, %v1560_v14  ;;  %2405 = vmatprep.mubr.msk.bf16.mxu0 %vm1618_vm12, %v1590_v15 }
  0xcd   : > { %v516_v16 = vpop.permute.xlu1 %515 }
  0xce   : > { %533 = vst.msk [vmem:[#allocation2 + $0x38] sm:$0xff] %vm525_vm3, %v516_v16 }
  0xcf   : > { %v508_v17 = vpop.permute.xlu0 %507 }
  0xd0   : > { %529 = vst.msk [vmem:[#allocation2 + $0x18] sm:$0xff] %vm525_vm3, %v508_v17 }
  0xd1   : > { %v660_v18 = vpop.permute.xlu1 %659  ;;  %v1595_v19 = vld [vmem:[#allocation2 + $0x28] sm:$0xff] }
  0xd2   : > { %678 = vst.msk [vmem:[#allocation2 + $0x30] sm:$0xff] %vm671_vm4, %v660_v18  ;;  %2414 = vmatmul.mubr.msk.bf16.vlgmr.msra.gmra.mrb[0].mxu1 %vm1618_vm12, %v1595_v19 }
  0xd3   : > { %v652_v20 = vpop.permute.xlu0 %651  ;;  %v1591_v21 = vld [vmem:[#allocation2 + $0x8] sm:$0xff] }
  0xd4   : > { %674 = vst.msk [vmem:[#allocation2 + $0x10] sm:$0xff] %vm671_vm4, %v652_v20  ;;  %2406 = vmatmul.mubr.msk.bf16.vlgmr.msra.gmra.mrb[0].mxu0 %vm1618_vm12, %v1591_v21 }
  0xd5   : > { %v662_v22 = vpop.permute.xlu1 %661 }
  0xd6   : > { %679 = vst.msk [vmem:[#allocation2 + $0x38] sm:$0xff] %vm671_vm4, %v662_v22 }
  0xd7   : > { %v654_v23 = vpop.permute.xlu0 %653 }
  0xd8   : > { %675 = vst.msk [vmem:[#allocation2 + $0x18] sm:$0xff] %vm671_vm4, %v654_v23 }
  0xd9   : > { %v753_v24 = vpop.permute.xlu1 %752 }
  0xda   : > { %771 = vst.msk [vmem:[#allocation2 + $0x30] sm:$0xff] %vm764_vm5, %v753_v24 }
  0xdb   : > { %v745_v25 = vpop.permute.xlu0 %744 }
  0xdc   : > { %767 = vst.msk [vmem:[#allocation2 + $0x10] sm:$0xff] %vm764_vm5, %v745_v25 }
  0xdd   : > { %v755_v26 = vpop.permute.xlu1 %754 }
  0xde   : > { %772 = vst.msk [vmem:[#allocation2 + $0x38] sm:$0xff] %vm764_vm5, %v755_v26 }
  0xdf   : > { %v747_v27 = vpop.permute.xlu0 %746 }
  0xe0   : > { %768 = vst.msk [vmem:[#allocation2 + $0x18] sm:$0xff] %vm764_vm5, %v747_v27 }
  0xe1   : > { %v970_v28 = vpop.permute.xlu1 %969 }
  0xe2   : > { %988 = vst.msk [vmem:[#allocation2 + $0x30] sm:$0xff] %vm981_vm7, %v970_v28 }
  0xe3   : > { %v962_v29 = vpop.permute.xlu0 %961 }
  0xe4   : > { %984 = vst.msk [vmem:[#allocation2 + $0x10] sm:$0xff] %vm981_vm7, %v962_v29 }
  0xe5   : > { %v972_v30 = vpop.permute.xlu1 %971 }
  0xe6   : > { %989 = vst.msk [vmem:[#allocation2 + $0x38] sm:$0xff] %vm981_vm7, %v972_v30 }
  0xe7   : > { %v964_v31 = vpop.permute.xlu0 %963 }
  0xe8   : > { %985 = vst.msk [vmem:[#allocation2 + $0x18] sm:$0xff] %vm981_vm7, %v964_v31 }
  0xe9   : > { %v1115_v32 = vpop.permute.xlu1 %1114 }
  0xea   : > { %1133 = vst.msk [vmem:[#allocation2 + $0x30] sm:$0xff] %vm1126_vm8, %v1115_v32 }
  0xeb   : > { %v1107_v33 = vpop.permute.xlu0 %1106 }
  0xec   : > { %1129 = vst.msk [vmem:[#allocation2 + $0x10] sm:$0xff] %vm1126_vm8, %v1107_v33 }
  0xed   : > { %v1117_v34 = vpop.permute.xlu1 %1116 }
  0xee   : > { %1134 = vst.msk [vmem:[#allocation2 + $0x38] sm:$0xff] %vm1126_vm8, %v1117_v34 }
  0xef   : > { %v1109_v35 = vpop.permute.xlu0 %1108 }
  0xf0   : > { %1130 = vst.msk [vmem:[#allocation2 + $0x18] sm:$0xff] %vm1126_vm8, %v1109_v35 }
  0xf1   : > { %v1208_v36 = vpop.permute.xlu1 %1207 }
  0xf2   : > { %1226 = vst.msk [vmem:[#allocation2 + $0x30] sm:$0xff] %vm1219_vm9, %v1208_v36 }
  0xf3   : > { %v1200_v37 = vpop.permute.xlu0 %1199 }
  0xf4   : > { %1222 = vst.msk [vmem:[#allocation2 + $0x10] sm:$0xff] %vm1219_vm9, %v1200_v37 }
  0xf5   : > { %v1210_v38 = vpop.permute.xlu1 %1209 }
  0xf6   : > { %1227 = vst.msk [vmem:[#allocation2 + $0x38] sm:$0xff] %vm1219_vm9, %v1210_v38 }
  0xf7   : > { %v1202_v39 = vpop.permute.xlu0 %1201 }
  0xf8   : > { %1223 = vst.msk [vmem:[#allocation2 + $0x18] sm:$0xff] %vm1219_vm9, %v1202_v39 }
  0xf9   : > { %v1425_v40 = vpop.permute.xlu1 %1424 }
  0xfa   : > { %1443 = vst.msk [vmem:[#allocation2 + $0x30] sm:$0xff] %vm1436_vm10, %v1425_v40 }
  0xfb   : > { %v1417_v41 = vpop.permute.xlu0 %1416 }
  0xfc   : > { %1439 = vst.msk [vmem:[#allocation2 + $0x10] sm:$0xff] %vm1436_vm10, %v1417_v41 }
  0xfd   : > { %v1427_v42 = vpop.permute.xlu1 %1426 }
  0xfe   : > { %1444 = vst.msk [vmem:[#allocation2 + $0x38] sm:$0xff] %vm1436_vm10, %v1427_v42 }
  0xff   : > { %v1419_v43 = vpop.permute.xlu0 %1418 }
 0x100   : > { %1440 = vst.msk [vmem:[#allocation2 + $0x18] sm:$0xff] %vm1436_vm10, %v1419_v43 }
 0x101   : > { %v1570_v44 = vpop.permute.xlu1 %1569 }
 0x102   : > { %1588 = vst.msk [vmem:[#allocation2 + $0x30] sm:$0xff] %vm1581_vm11, %v1570_v44 }
 0x103   : > { %v1562_v45 = vpop.permute.xlu0 %1561 }
 0x104   : > { %1584 = vst.msk [vmem:[#allocation2 + $0x10] sm:$0xff] %vm1581_vm11, %v1562_v45 }
 0x105   : > { %v1572_v46 = vpop.permute.xlu1 %1571 }
 0x106   : > { %1589 = vst.msk [vmem:[#allocation2 + $0x38] sm:$0xff] %vm1581_vm11, %v1572_v46 }
 0x107   : > { %v1564_v47 = vpop.permute.xlu0 %1563 }
 0x108   : > { %1585 = vst.msk [vmem:[#allocation2 + $0x18] sm:$0xff] %vm1581_vm11, %v1564_v47 }
 0x109   : > { %v1596_v48 = vld [vmem:[#allocation2 + $0x30] sm:$0xff] }
 0x10a   : > { %2417 = vmatprep.mubr.msk.bf16.mxu1 %vm1618_vm12, %v1596_v48 }
 0x10b   : > { %v1592_v49 = vld [vmem:[#allocation2 + $0x10] sm:$0xff] }
 0x10c   : > { %2409 = vmatprep.mubr.msk.bf16.mxu0 %vm1618_vm12, %v1592_v49 }
 0x10d   : > { %v1597_v50 = vld [vmem:[#allocation2 + $0x38] sm:$0xff] }
 0x10e   : > { %2418 = vmatmul.mubr.msk.bf16.gmra.mrb[4].mxu1 %vm1618_vm12, %v1597_v50 }
 0x10f   : > { %v1593_v51 = vld [vmem:[#allocation2 + $0x18] sm:$0xff] }
 0x110   : > { %2410 = vmatmul.mubr.msk.bf16.gmra.mrb[4].mxu0 %vm1618_vm12, %v1593_v51 }
 0x1a5   : > { %v3060_v52 = vpop.f32.mrb[0].mxu1 }
 0x1a6   : > { %v1713_v54 = vpop.f32.mrb[1].mxu1 }
 0x1a7   : > { %v2407_v53 = vpop.f32.mrb[0].mxu0  ;;  %v3065_v56 = vpop.f32.mrb[2].mxu1 }
 0x1a8   : > { %v1681_v55 = vpop.f32.mrb[1].mxu0  ;;  %v2369_v58 = vpack.c.bf16 %v3065_v56, %v3060_v52  ;;  %v1716_v59 = vpop.f32.mrb[3].mxu1 }
 0x1a9   : > { %v2408_v57 = vpop.f32.mrb[2].mxu0  ;;  %v2364_v62 = vpack.c.bf16 %v1716_v59, %v1713_v54 }
 0x1aa   : > { %v2349_v60 = vpack.c.bf16 %v2408_v57, %v2407_v53  ;;  %v1684_v61 = vpop.f32.mrb[3].mxu0  ;;  %2385 = vst [vmem:[%s228_s12 + $0x28] sm:$0xff] %v2369_v58  }
 0x1ab   : > { %v2344_v63 = vpack.c.bf16 %v1684_v61, %v1681_v55  ;;  %2384 = vst [vmem:[%s228_s12 + $0x20] sm:$0xff] %v2364_v62  }
 0x1ac   : > { %2381 = vst [vmem:[%s228_s12 + $0x8] sm:$0xff] %v2349_v60  }
 0x1ad   : > { %2345 = vst [vmem:[%s228_s12] sm:$0xff] %v2344_v63  }
 0x1e1   : > { %v2419_v0 = vpop.f32.mrb[4].mxu1 }
 0x1e2   : > { %v1729_v2 = vpop.f32.mrb[5].mxu1 }
 0x1e3   : > { %v2411_v1 = vpop.f32.mrb[4].mxu0  ;;  %v2420_v4 = vpop.f32.mrb[6].mxu1  ;;  %1827 = sbr.rel (%p2321_p7) target bundleno = 490 (0x1ea), region = 32 }
 0x1e4   : > { %v1697_v3 = vpop.f32.mrb[5].mxu0  ;;  %v2379_v6 = vpack.c.bf16 %v2420_v4, %v2419_v0  ;;  %v1732_v7 = vpop.f32.mrb[7].mxu1 }
 0x1e5   : > { %v2412_v5 = vpop.f32.mrb[6].mxu0  ;;  %v2374_v10 = vpack.c.bf16 %v1732_v7, %v1729_v2 }
 0x1e6   : > { %v2359_v8 = vpack.c.bf16 %v2412_v5, %v2411_v1  ;;  %v1700_v9 = vpop.f32.mrb[7].mxu0  ;;  %2387 = vst [vmem:[%s228_s12 + $0x38] sm:$0xff] %v2379_v6  }
 0x1e7   : > { %v2354_v11 = vpack.c.bf16 %v1700_v9, %v1697_v3  ;;  %2386 = vst [vmem:[%s228_s12 + $0x30] sm:$0xff] %v2374_v10  }
 0x1e8   : > { %2383 = vst [vmem:[%s228_s12 + $0x18] sm:$0xff] %v2359_v8  }
 0x1e9   : > { %2382 = vst [vmem:[%s228_s12 + $0x10] sm:$0xff] %v2354_v11  }
 0x1ea PF: > { %v1831_v13 = vadd.f32 %v1684_v61, %v1681_v55  ;;  %v1855_v14 = vmul.f32 %v1681_v55, %v1681_v55  ;;  %v1856_v15 = vmul.f32 %v1684_v61, %v1684_v61  ;;  %v1857_v17 = vmul.f32 %v2407_v53, %v2407_v53 }
 0x1eb   : > { %v1858_v19 = vmul.f32 %v2408_v57, %v2408_v57  ;;  %v1859_v22 = vmul.f32 %v1697_v3, %v1697_v3  ;;  %v1860_v25 = vmul.f32 %v1700_v9, %v1700_v9  ;;  %v1861_v28 = vmul.f32 %v2411_v1, %v2411_v1 }
 0x1ec   : > { %v1832_v16 = vadd.f32 %v2407_v53, %v1831_v13  ;;  %v1871_v20 = vadd.f32 %v1856_v15, %v1855_v14  ;;  %v1862_v31 = vmul.f32 %v2412_v5, %v2412_v5  ;;  %v1863_v34 = vmul.f32 %v1713_v54, %v1713_v54 }
 0x1ed   : > { %v1864_v37 = vmul.f32 %v1716_v59, %v1716_v59  ;;  %v1865_v40 = vmul.f32 %v3060_v52, %v3060_v52  ;;  %v1866_v43 = vmul.f32 %v3065_v56, %v3065_v56  ;;  %v1867_v46 = vmul.f32 %v1729_v2, %v1729_v2 }
 0x1ee   : > { %v1833_v18 = vadd.f32 %v2408_v57, %v1832_v16  ;;  %v1872_v23 = vadd.f32 %v1871_v20, %v1857_v17  ;;  %v1868_v49 = vmul.f32 %v1732_v7, %v1732_v7  ;;  %v1869_v53 = vmul.f32 %v2419_v0, %v2419_v0 }
 0x1ef   : > { %v1870_v57 = vmul.f32 %v2420_v4, %v2420_v4 }
 0x1f0   : > { %v1834_v21 = vadd.f32 %v1833_v18, %v1697_v3  ;;  %v1873_v26 = vadd.f32 %v1872_v23, %v1858_v19 }
 0x1f2   : > { %v1835_v24 = vadd.f32 %v1834_v21, %v1700_v9  ;;  %v1874_v29 = vadd.f32 %v1873_v26, %v1859_v22 }
 0x1f4   : > { %v1836_v27 = vadd.f32 %v2411_v1, %v1835_v24  ;;  %v1875_v32 = vadd.f32 %v1874_v29, %v1860_v25 }
 0x1f6   : > { %v1837_v30 = vadd.f32 %v2412_v5, %v1836_v27  ;;  %v1876_v35 = vadd.f32 %v1875_v32, %v1861_v28  ;;  %v1830_v5 = vld [vmem:[%s2716_s27] sm:$0x1] }
 0x1f8   : > { %v1838_v33 = vadd.f32 %v1837_v30, %v1713_v54  ;;  %v1877_v38 = vadd.f32 %v1876_v35, %v1862_v31 }
 0x1fa   : > { %v1839_v36 = vadd.f32 %v1838_v33, %v1716_v59  ;;  %v1878_v41 = vadd.f32 %v1877_v38, %v1863_v34 }
 0x1fc   : > { %v1840_v39 = vadd.f32 %v3060_v52, %v1839_v36  ;;  %v1879_v44 = vadd.f32 %v1878_v41, %v1864_v37 }
 0x1fe   : > { %v1841_v42 = vadd.f32 %v3065_v56, %v1840_v39  ;;  %v1880_v47 = vadd.f32 %v1879_v44, %v1865_v40 }
 0x200   : > { %v1842_v45 = vadd.f32 %v1841_v42, %v1729_v2  ;;  %v1881_v50 = vadd.f32 %v1880_v47, %v1866_v43 }
 0x202   : > { %v1843_v48 = vadd.f32 %v1842_v45, %v1732_v7  ;;  %v1882_v54 = vadd.f32 %v1881_v50, %v1867_v46 }
 0x204   : > { %v1844_v51 = vadd.f32 %v2419_v0, %v1843_v48  ;;  %v1883_v52 = vadd.f32 %v1882_v54, %v1868_v49 }
 0x206   : > { %v1845_v55 = vadd.f32 %v2420_v4, %v1844_v51  ;;  %v1884_v59 = vadd.f32 %v1883_v52, %v1869_v53  ;;  %v1854_v4 = vld [vmem:[%s2721_s30] sm:$0x1] }
 0x208   : > { %v1846_v58 = vrot.slane %v1845_v55, 4  ;;  %v1885_v56 = vadd.f32 %v1884_v59, %v1870_v57 }
 0x20a   : > { %v1847_v60 = vadd.f32 %v1846_v58, %v1845_v55  ;;  %v1886_v62 = vrot.slane %v1885_v56, 4 }
 0x20c   : > { %v1848_v61 = vrot.slane %v1847_v60, 2  ;;  %v1887_v1 = vadd.f32 %v1886_v62, %v1885_v56 }
 0x20e   : > { %v1849_v63 = vadd.f32 %v1848_v61, %v1847_v60  ;;  %v1888_v3 = vrot.slane %v1887_v1, 2 }
 0x210   : > { %v1850_v2 = vrot.slane %v1849_v63, 1  ;;  %v1889_v0 = vadd.f32 %v1888_v3, %v1887_v1 }
 0x212   : > { %v1851_v6 = vadd.f32 %v1850_v2, %v1849_v63  ;;  %v1890_v8 = vrot.slane %v1889_v0, 1 }
 0x214   : > { %v1852_v7 = vadd.f32 %v1851_v6, %v1830_v5  ;;  %v1891_v9 = vadd.f32 %v1890_v8, %v1889_v0 }
 0x216   : > { %1853 = vst [vmem:[%s2716_s27] sm:$0x1] %v1852_v7  ;;  %v1892_v10 = vadd.f32 %v1891_v9, %v1854_v4 }
 0x218   : > { %1893 = vst [vmem:[%s2721_s30] sm:$0x1] %v1892_v10 }
 0x219 PF: > { %s15_s19 = sadd.s32 1, %s2640_s19   ;;  %s3102_s15 = smov %s2632_s17 }
 0x21a   : > { %p12_p8 = scmp.ge.s32.totalorder %s15_s19, 6   ;;  %s3103_s16 = smov %s2636_s18 }
 0x21b   : > { %s3104_s17 = smov %s3107_s20  ;;  %s3105_s18 = smov %s3111_s21 }
 0x21c   :  { %14 = sbr.rel (!%p12_p8) target bundleno = 3 (0x3), region = 89 }

</bundles_post_ra>
